<compile_context>
chip_gen: v6e
topology: v6e:2x2x1
jax: 0.10.0
libtpu: 0.0.40
codegen_flags: <defaults>
</compile_context>

<pallas_src>
import math

import jax
import jax.numpy as jnp
from jax import lax
from jax.experimental import pallas as pl
from jax.experimental.pallas import tpu as pltpu

# ----------------------------- configuration (small shapes) -----------------------------
IMAGE_SIZE = 32          # module default is 800; small for the synthetic kernel
TEX_SIZE = 4             # module default texture_size=6; small for the synthetic kernel
N_VERTS = 24
N_FACES = 16
VIEWING_ANGLE = 45.0
LIGHT_IA = 0.5           # light_intensity_ambient    (colour (1,1,1))
LIGHT_ID = 0.5           # light_intensity_directional (colour (1,1,1))
LIGHT_DIR = (0.0, 0.0, 1.0)
NEAR, FAR = 0.1, 100.0
HW = IMAGE_SIZE * IMAGE_SIZE


# ----------------------------------- fused Pallas kernel --------------------------------
def render_kernel(tex_ref, fv0_ref, fv1_ref, fv2_ref, eye_ref, rot_ref, img_ref):
    """Fused shade + look-transform + vectorized z-buffered flat rasterization.

    tex_ref : (3, F, T^3) VMEM  render textures, channel-major, texels on the lane axis
    fv*_ref : (F, 3)      VMEM  world-space face vertices (v0 / v1 / v2)
    eye_ref : (3,)        SMEM  camera eye
    rot_ref : (9,)        SMEM  row-major 'look' rotation, rows = camera x/y/z axes
    img_ref : (3, H*W)    VMEM  lane-dense output image (wrapper reshapes to (1,3,H,W))
    """
    # ---- 1) texture shading: per-face mean of tanh(texture) ------------------------------
    mean_col = jnp.mean(jnp.tanh(tex_ref[...]), axis=-1)              # (3, F)

    # ---- 2) Lambert lighting from world-space face normals -------------------------------
    v0 = fv0_ref[...]
    v1 = fv1_ref[...]
    v2 = fv2_ref[...]
    e10 = v0 - v1
    e12 = v2 - v1
    ax, ay, az = e12[:, 0:1], e12[:, 1:2], e12[:, 2:3]
    bx, by, bz = e10[:, 0:1], e10[:, 1:2], e10[:, 2:3]
    nx = ay * bz - az * by
    ny = az * bx - ax * bz
    nz = ax * by - ay * bx
    inv_norm = lax.rsqrt(nx * nx + ny * ny + nz * nz + 1e-10)
    dx, dy, dz = LIGHT_DIR
    cos = jnp.maximum((nx * dx + ny * dy + nz * dz) * inv_norm, 0.0)  # (F, 1)
    light = LIGHT_IA + LIGHT_ID * cos                                 # (F, 1)  (colours = 1)

    # ---- 3) 'look' camera transform + NMR perspective divide -----------------------------
    ex, ey, ez = eye_ref[0], eye_ref[1], eye_ref[2]
    r00, r01, r02 = rot_ref[0], rot_ref[1], rot_ref[2]
    r10, r11, r12 = rot_ref[3], rot_ref[4], rot_ref[5]
    r20, r21, r22 = rot_ref[6], rot_ref[7], rot_ref[8]
    tanw = math.tan(math.radians(VIEWING_ANGLE))

    def to_screen(v):                              # (F,3) -> screen x, y and camera z, each (F,1)
        wx = v[:, 0:1] - ex
        wy = v[:, 1:2] - ey
        wz = v[:, 2:3] - ez
        cx = r00 * wx + r01 * wy + r02 * wz        # rows of R are the camera axes (v @ R^T)
        cy = r10 * wx + r11 * wy + r12 * wz
        cz = r20 * wx + r21 * wy + r22 * wz
        inv = pl.reciprocal(cz * tanw, approx=True)   # one EUP reciprocal instead of two divides
        return cx * inv, cy * inv, cz

    x0, y0, z0 = to_screen(v0)
    x1, y1, z1 = to_screen(v1)
    x2, y2, z2 = to_screen(v2)

    # ---- 4) per-face edge / depth plane coefficients, computed once ----------------------
    d = (y1 - y2) * (x0 - x2) + (x2 - x1) * (y0 - y2)
    good = jnp.abs(d) > 1e-8
    inv_d = jnp.where(good, 1.0 / jnp.where(good, d, 1.0), 0.0)
    a0 = (y1 - y2) * inv_d
    b0 = (x2 - x1) * inv_d
    c0 = -(a0 * x2 + b0 * y2)
    a1 = (y2 - y0) * inv_d
    b1 = (x0 - x2) * inv_d
    c1 = -(a1 * x2 + b1 * y2)
    rz0 = 1.0 / z0                                  # per-face reciprocals (hoisted out of pixels)
    rz1 = 1.0 / z1
    rz2 = 1.0 / z2
    azc = a0 * (rz0 - rz2) + a1 * (rz1 - rz2)       # 1/z is affine in (xp, yp)
    bzc = b0 * (rz0 - rz2) + b1 * (rz1 - rz2)
    czc = c0 * (rz0 - rz2) + c1 * (rz1 - rz2) + rz2
    # degenerate faces: force interpolated 1/z == 0 so they always fail the depth-range test
    azc = jnp.where(good, azc, 0.0)
    bzc = jnp.where(good, bzc, 0.0)
    czc = jnp.where(good, czc, 0.0)

    # ---- 5) lane-dense pixel grid: all H*W pixels on the lane axis -----------------------
    pf = lax.broadcasted_iota(jnp.int32, (1, HW), 1).astype(jnp.float32)
    yi = jnp.floor(pf * (1.0 / IMAGE_SIZE))         # exact: IMAGE_SIZE is a power of two
    xi = pf - yi * IMAGE_SIZE
    xp = (2.0 * xi + 1.0 - IMAGE_SIZE) / IMAGE_SIZE
    yp = -(2.0 * yi + 1.0 - IMAGE_SIZE) / IMAGE_SIZE   # row 0 = top of image (NMR vertical flip)

    # barycentric weights & perspective-correct inverse depth for ALL faces x pixels
    w0 = a0 * xp + b0 * yp + c0                     # (F, H*W)
    w1 = a1 * xp + b1 * yp + c1
    w2 = 1.0 - w0 - w1
    inv_z = azc * xp + bzc * yp + czc               # interpolated 1/z, (F, H*W)

    # ---- 6) vectorized z-buffer resolve in inverse-depth space ---------------------------
    inside = (w0 >= 0.0) & (w1 >= 0.0) & (w2 >= 0.0)
    valid = inside & (inv_z > 1.0 / FAR) & (inv_z < 1.0 / NEAR)
    key = jnp.where(valid, inv_z, -1.0)             # invalid faces can never win
    best = jnp.max(key, axis=0, keepdims=True)      # (1, H*W) nearest inverse depth (XLU reduce)
    win = (key == best) & valid                     # one-hot winner mask, (F, H*W)
    win_f = win.astype(jnp.float32)
    cnt = jnp.sum(win_f, axis=0, keepdims=True)     # (1, H*W); >1 only on exact-float depth ties
    scale = jnp.where(cnt > 1.0, 1.0 / jnp.maximum(cnt, 1.0), 1.0)

    # compose the image with one MXU matmul: lit one-hot weights contracted against face colours
    weights = win_f * light                         # (F, H*W)
    img = jnp.dot(mean_col, weights,
                  precision=lax.Precision.HIGHEST,
                  preferred_element_type=jnp.float32)      # (3, H*W)
    img_ref[...] = img * scale                      # black background where no face wins


# --------------------------------- pallas_call wrapper ----------------------------------
def render(tex, fv0, fv1, fv2, eye, rot):
    vmem = pl.BlockSpec(memory_space=pltpu.MemorySpace.VMEM)
    smem = pl.BlockSpec(memory_space=pltpu.MemorySpace.SMEM)
    img = pl.pallas_call(
        render_kernel,
        out_shape=jax.ShapeDtypeStruct((3, HW), jnp.float32),
        in_specs=[vmem, vmem, vmem, vmem, smem, smem],
        out_specs=vmem,
    )(tex, fv0, fv1, fv2, eye, rot)
    return img.reshape(1, 3, IMAGE_SIZE, IMAGE_SIZE)


# -------------------------------------- glue / setup ------------------------------------
def look_rotation(direction, up):
    """'look' rotation of neural_renderer: rows of R are the camera x/y/z axes."""
    z = direction / jnp.linalg.norm(direction)
    x = jnp.cross(up, z)
    x = x / jnp.linalg.norm(x)
    y = jnp.cross(z, x)
    return jnp.stack([x, y, z], axis=0).astype(jnp.float32)        # (3, 3)


@jax.jit
def neural_renderer_forward(vertices, faces, render_textures):
    """Equivalent of NeuralRenderer.forward(); returns the rendered image (B, 3, H, W)."""
    f = faces.shape[1]
    t = render_textures.shape[2]

    v_world = vertices[0].astype(jnp.float32)                      # (N, 3)
    f_idx = faces[0]                                               # (F, 3) int32
    fv_world = v_world[f_idx]                                      # (F, 3, 3) gather in glue

    # channel-major textures with the T^3 texel axis on lanes: (3, F, T^3)
    tex = jnp.transpose(
        render_textures[0].reshape(f, t * t * t, 3).astype(jnp.float32), (2, 0, 1))

    # default 'look' camera of neural_renderer.Renderer (viewing_angle=45)
    eye = jnp.array([0.0, 0.0,
                     -(1.0 / math.tan(math.radians(VIEWING_ANGLE)) + 1.0)], jnp.float32)
    rot = look_rotation(jnp.array([0.0, 0.0, 1.0], jnp.float32),
                        jnp.array([0.0, 1.0, 0.0], jnp.float32))

    return render(tex,
                  fv_world[:, 0, :], fv_world[:, 1, :], fv_world[:, 2, :],
                  eye, rot.reshape(9))


# ------------------------------------------ main ----------------------------------------
if __name__ == "__main__":
    key = jax.random.PRNGKey(0)
    kv, kf, kt = jax.random.split(key, 3)

    # synthetic deterministic "obj": vertices (1,N,3), faces (1,F,3), textures (1,F,T,T,T,3)
    vertices = (jax.random.uniform(kv, (1, N_VERTS, 3), jnp.float32) - 0.5) * 1.6
    faces = jax.random.randint(kf, (1, N_FACES, 3), 0, N_VERTS, dtype=jnp.int32)
    textures = jax.random.normal(kt, (1, N_FACES, TEX_SIZE, TEX_SIZE, TEX_SIZE, 3),
                                 jnp.float32) * 0.5

    # selected_faces mask exactly as in NeuralRenderer.__init__ (1-indexed face ids)
    selected_faces = [1, 3, 5, 7, 9, 11, 13, 15]
    mask = jnp.zeros((N_FACES,), jnp.float32).at[
        jnp.array([i - 1 for i in selected_faces], jnp.int32)].set(1.0)
    render_textures = textures * mask[None, :, None, None, None, None]

    image = neural_renderer_forward(vertices, faces, render_textures)
    image = jax.block_until_ready(image)

    assert image.shape == (1, 3, IMAGE_SIZE, IMAGE_SIZE), image.shape
    assert bool(jnp.all(jnp.isfinite(image)))
    print("KERNEL_OK")
</pallas_src>

<mosaic_0001>
module attributes {stable_mosaic.version = 11 : i64} {
  func.func @render_kernel(%arg0: memref<3x16x64xf32, #tpu.memory_space<vmem>>, %arg1: memref<16x3xf32, #tpu.memory_space<vmem>>, %arg2: memref<16x3xf32, #tpu.memory_space<vmem>>, %arg3: memref<16x3xf32, #tpu.memory_space<vmem>>, %arg4: memref<3xf32, #tpu.memory_space<smem>>, %arg5: memref<9xf32, #tpu.memory_space<smem>>, %arg6: memref<3x1024xf32, #tpu.memory_space<vmem>>) attributes {dimension_semantics = [], scalar_prefetch = 0 : i64, scratch_operands = 0 : i64, tpu.core_type = #tpu.core_type<tc>} {
    %c0 = arith.constant 0 : index
    %c0_0 = arith.constant 0 : index
    %c0_1 = arith.constant 0 : index
    %0 = vector.load %arg0[%c0, %c0_0, %c0_1] : memref<3x16x64xf32, #tpu.memory_space<vmem>>, vector<3x16x64xf32>
    %1 = math.tanh %0 : vector<3x16x64xf32>
    %cst = arith.constant dense<0.000000e+00> : vector<3x16xf32>
    %2 = vector.multi_reduction <add>, %1, %cst [2] : vector<3x16x64xf32> to vector<3x16xf32>
    %cst_2 = arith.constant 6.400000e+01 : f32
    %3 = vector.broadcast %cst_2 : f32 to vector<3x16xf32>
    %4 = arith.divf %2, %3 : vector<3x16xf32>
    %c0_3 = arith.constant 0 : index
    %c0_4 = arith.constant 0 : index
    %5 = vector.load %arg1[%c0_3, %c0_4] : memref<16x3xf32, #tpu.memory_space<vmem>>, vector<16x3xf32>
    %c0_5 = arith.constant 0 : index
    %c0_6 = arith.constant 0 : index
    %6 = vector.load %arg2[%c0_5, %c0_6] : memref<16x3xf32, #tpu.memory_space<vmem>>, vector<16x3xf32>
    %c0_7 = arith.constant 0 : index
    %c0_8 = arith.constant 0 : index
    %7 = vector.load %arg3[%c0_7, %c0_8] : memref<16x3xf32, #tpu.memory_space<vmem>>, vector<16x3xf32>
    %8 = arith.subf %5, %6 : vector<16x3xf32>
    %9 = arith.subf %7, %6 : vector<16x3xf32>
    %10 = vector.extract_strided_slice %9 {offsets = [0, 0], sizes = [16, 1], strides = [1, 1]} : vector<16x3xf32> to vector<16x1xf32>
    %11 = vector.extract_strided_slice %9 {offsets = [0, 1], sizes = [16, 1], strides = [1, 1]} : vector<16x3xf32> to vector<16x1xf32>
    %12 = vector.extract_strided_slice %9 {offsets = [0, 2], sizes = [16, 1], strides = [1, 1]} : vector<16x3xf32> to vector<16x1xf32>
    %13 = vector.extract_strided_slice %8 {offsets = [0, 0], sizes = [16, 1], strides = [1, 1]} : vector<16x3xf32> to vector<16x1xf32>
    %14 = vector.extract_strided_slice %8 {offsets = [0, 1], sizes = [16, 1], strides = [1, 1]} : vector<16x3xf32> to vector<16x1xf32>
    %15 = vector.extract_strided_slice %8 {offsets = [0, 2], sizes = [16, 1], strides = [1, 1]} : vector<16x3xf32> to vector<16x1xf32>
    %16 = arith.mulf %11, %15 : vector<16x1xf32>
    %17 = arith.mulf %12, %14 : vector<16x1xf32>
    %18 = arith.subf %16, %17 : vector<16x1xf32>
    %19 = arith.mulf %12, %13 : vector<16x1xf32>
    %20 = arith.mulf %10, %15 : vector<16x1xf32>
    %21 = arith.subf %19, %20 : vector<16x1xf32>
    %22 = arith.mulf %10, %14 : vector<16x1xf32>
    %23 = arith.mulf %11, %13 : vector<16x1xf32>
    %24 = arith.subf %22, %23 : vector<16x1xf32>
    %25 = arith.mulf %18, %18 : vector<16x1xf32>
    %26 = arith.mulf %21, %21 : vector<16x1xf32>
    %27 = arith.addf %25, %26 : vector<16x1xf32>
    %28 = arith.mulf %24, %24 : vector<16x1xf32>
    %29 = arith.addf %27, %28 : vector<16x1xf32>
    %cst_9 = arith.constant 1.000000e-10 : f32
    %30 = vector.broadcast %cst_9 : f32 to vector<16x1xf32>
    %31 = arith.addf %29, %30 : vector<16x1xf32>
    %32 = math.rsqrt %31 : vector<16x1xf32>
    %cst_10 = arith.constant 0.000000e+00 : f32
    %33 = vector.broadcast %cst_10 : f32 to vector<16x1xf32>
    %34 = arith.mulf %18, %33 : vector<16x1xf32>
    %cst_11 = arith.constant 0.000000e+00 : f32
    %35 = vector.broadcast %cst_11 : f32 to vector<16x1xf32>
    %36 = arith.mulf %21, %35 : vector<16x1xf32>
    %37 = arith.addf %34, %36 : vector<16x1xf32>
    %cst_12 = arith.constant 1.000000e+00 : f32
    %38 = vector.broadcast %cst_12 : f32 to vector<16x1xf32>
    %39 = arith.mulf %24, %38 : vector<16x1xf32>
    %40 = arith.addf %37, %39 : vector<16x1xf32>
    %41 = arith.mulf %40, %32 : vector<16x1xf32>
    %cst_13 = arith.constant 0.000000e+00 : f32
    %42 = vector.broadcast %cst_13 : f32 to vector<16x1xf32>
    %43 = arith.maximumf %41, %42 : vector<16x1xf32>
    %cst_14 = arith.constant 5.000000e-01 : f32
    %44 = vector.broadcast %cst_14 : f32 to vector<16x1xf32>
    %45 = arith.mulf %44, %43 : vector<16x1xf32>
    %cst_15 = arith.constant 5.000000e-01 : f32
    %46 = vector.broadcast %cst_15 : f32 to vector<16x1xf32>
    %47 = arith.addf %46, %45 : vector<16x1xf32>
    %c0_16 = arith.constant 0 : index
    %48 = memref.load %arg4[%c0_16] : memref<3xf32, #tpu.memory_space<smem>>
    %c1 = arith.constant 1 : index
    %49 = memref.load %arg4[%c1] : memref<3xf32, #tpu.memory_space<smem>>
    %c2 = arith.constant 2 : index
    %50 = memref.load %arg4[%c2] : memref<3xf32, #tpu.memory_space<smem>>
    %c0_17 = arith.constant 0 : index
    %51 = memref.load %arg5[%c0_17] : memref<9xf32, #tpu.memory_space<smem>>
    %c1_18 = arith.constant 1 : index
    %52 = memref.load %arg5[%c1_18] : memref<9xf32, #tpu.memory_space<smem>>
    %c2_19 = arith.constant 2 : index
    %53 = memref.load %arg5[%c2_19] : memref<9xf32, #tpu.memory_space<smem>>
    %c3 = arith.constant 3 : index
    %54 = memref.load %arg5[%c3] : memref<9xf32, #tpu.memory_space<smem>>
    %c4 = arith.constant 4 : index
    %55 = memref.load %arg5[%c4] : memref<9xf32, #tpu.memory_space<smem>>
    %c5 = arith.constant 5 : index
    %56 = memref.load %arg5[%c5] : memref<9xf32, #tpu.memory_space<smem>>
    %c6 = arith.constant 6 : index
    %57 = memref.load %arg5[%c6] : memref<9xf32, #tpu.memory_space<smem>>
    %c7 = arith.constant 7 : index
    %58 = memref.load %arg5[%c7] : memref<9xf32, #tpu.memory_space<smem>>
    %c8 = arith.constant 8 : index
    %59 = memref.load %arg5[%c8] : memref<9xf32, #tpu.memory_space<smem>>
    %60 = vector.extract_strided_slice %5 {offsets = [0, 0], sizes = [16, 1], strides = [1, 1]} : vector<16x3xf32> to vector<16x1xf32>
    %61 = vector.broadcast %48 : f32 to vector<16x1xf32>
    %62 = arith.subf %60, %61 : vector<16x1xf32>
    %63 = vector.extract_strided_slice %5 {offsets = [0, 1], sizes = [16, 1], strides = [1, 1]} : vector<16x3xf32> to vector<16x1xf32>
    %64 = vector.broadcast %49 : f32 to vector<16x1xf32>
    %65 = arith.subf %63, %64 : vector<16x1xf32>
    %66 = vector.extract_strided_slice %5 {offsets = [0, 2], sizes = [16, 1], strides = [1, 1]} : vector<16x3xf32> to vector<16x1xf32>
    %67 = vector.broadcast %50 : f32 to vector<16x1xf32>
    %68 = arith.subf %66, %67 : vector<16x1xf32>
    %69 = vector.broadcast %51 : f32 to vector<16x1xf32>
    %70 = arith.mulf %69, %62 : vector<16x1xf32>
    %71 = vector.broadcast %52 : f32 to vector<16x1xf32>
    %72 = arith.mulf %71, %65 : vector<16x1xf32>
    %73 = arith.addf %70, %72 : vector<16x1xf32>
    %74 = vector.broadcast %53 : f32 to vector<16x1xf32>
    %75 = arith.mulf %74, %68 : vector<16x1xf32>
    %76 = arith.addf %73, %75 : vector<16x1xf32>
    %77 = vector.broadcast %54 : f32 to vector<16x1xf32>
    %78 = arith.mulf %77, %62 : vector<16x1xf32>
    %79 = vector.broadcast %55 : f32 to vector<16x1xf32>
    %80 = arith.mulf %79, %65 : vector<16x1xf32>
    %81 = arith.addf %78, %80 : vector<16x1xf32>
    %82 = vector.broadcast %56 : f32 to vector<16x1xf32>
    %83 = arith.mulf %82, %68 : vector<16x1xf32>
    %84 = arith.addf %81, %83 : vector<16x1xf32>
    %85 = vector.broadcast %57 : f32 to vector<16x1xf32>
    %86 = arith.mulf %85, %62 : vector<16x1xf32>
    %87 = vector.broadcast %58 : f32 to vector<16x1xf32>
    %88 = arith.mulf %87, %65 : vector<16x1xf32>
    %89 = arith.addf %86, %88 : vector<16x1xf32>
    %90 = vector.broadcast %59 : f32 to vector<16x1xf32>
    %91 = arith.mulf %90, %68 : vector<16x1xf32>
    %92 = arith.addf %89, %91 : vector<16x1xf32>
    %cst_20 = arith.constant 1.000000e+00 : f32
    %93 = vector.broadcast %cst_20 : f32 to vector<16x1xf32>
    %94 = arith.mulf %92, %93 : vector<16x1xf32>
    %95 = tpu.reciprocal %94 {approx = true} : vector<16x1xf32> -> vector<16x1xf32>
    %96 = arith.mulf %76, %95 : vector<16x1xf32>
    %97 = arith.mulf %84, %95 : vector<16x1xf32>
    %98 = vector.extract_strided_slice %6 {offsets = [0, 0], sizes = [16, 1], strides = [1, 1]} : vector<16x3xf32> to vector<16x1xf32>
    %99 = vector.broadcast %48 : f32 to vector<16x1xf32>
    %100 = arith.subf %98, %99 : vector<16x1xf32>
    %101 = vector.extract_strided_slice %6 {offsets = [0, 1], sizes = [16, 1], strides = [1, 1]} : vector<16x3xf32> to vector<16x1xf32>
    %102 = vector.broadcast %49 : f32 to vector<16x1xf32>
    %103 = arith.subf %101, %102 : vector<16x1xf32>
    %104 = vector.extract_strided_slice %6 {offsets = [0, 2], sizes = [16, 1], strides = [1, 1]} : vector<16x3xf32> to vector<16x1xf32>
    %105 = vector.broadcast %50 : f32 to vector<16x1xf32>
    %106 = arith.subf %104, %105 : vector<16x1xf32>
    %107 = vector.broadcast %51 : f32 to vector<16x1xf32>
    %108 = arith.mulf %107, %100 : vector<16x1xf32>
    %109 = vector.broadcast %52 : f32 to vector<16x1xf32>
    %110 = arith.mulf %109, %103 : vector<16x1xf32>
    %111 = arith.addf %108, %110 : vector<16x1xf32>
    %112 = vector.broadcast %53 : f32 to vector<16x1xf32>
    %113 = arith.mulf %112, %106 : vector<16x1xf32>
    %114 = arith.addf %111, %113 : vector<16x1xf32>
    %115 = vector.broadcast %54 : f32 to vector<16x1xf32>
    %116 = arith.mulf %115, %100 : vector<16x1xf32>
    %117 = vector.broadcast %55 : f32 to vector<16x1xf32>
    %118 = arith.mulf %117, %103 : vector<16x1xf32>
    %119 = arith.addf %116, %118 : vector<16x1xf32>
    %120 = vector.broadcast %56 : f32 to vector<16x1xf32>
    %121 = arith.mulf %120, %106 : vector<16x1xf32>
    %122 = arith.addf %119, %121 : vector<16x1xf32>
    %123 = vector.broadcast %57 : f32 to vector<16x1xf32>
    %124 = arith.mulf %123, %100 : vector<16x1xf32>
    %125 = vector.broadcast %58 : f32 to vector<16x1xf32>
    %126 = arith.mulf %125, %103 : vector<16x1xf32>
    %127 = arith.addf %124, %126 : vector<16x1xf32>
    %128 = vector.broadcast %59 : f32 to vector<16x1xf32>
    %129 = arith.mulf %128, %106 : vector<16x1xf32>
    %130 = arith.addf %127, %129 : vector<16x1xf32>
    %cst_21 = arith.constant 1.000000e+00 : f32
    %131 = vector.broadcast %cst_21 : f32 to vector<16x1xf32>
    %132 = arith.mulf %130, %131 : vector<16x1xf32>
    %133 = tpu.reciprocal %132 {approx = true} : vector<16x1xf32> -> vector<16x1xf32>
    %134 = arith.mulf %114, %133 : vector<16x1xf32>
    %135 = arith.mulf %122, %133 : vector<16x1xf32>
    %136 = vector.extract_strided_slice %7 {offsets = [0, 0], sizes = [16, 1], strides = [1, 1]} : vector<16x3xf32> to vector<16x1xf32>
    %137 = vector.broadcast %48 : f32 to vector<16x1xf32>
    %138 = arith.subf %136, %137 : vector<16x1xf32>
    %139 = vector.extract_strided_slice %7 {offsets = [0, 1], sizes = [16, 1], strides = [1, 1]} : vector<16x3xf32> to vector<16x1xf32>
    %140 = vector.broadcast %49 : f32 to vector<16x1xf32>
    %141 = arith.subf %139, %140 : vector<16x1xf32>
    %142 = vector.extract_strided_slice %7 {offsets = [0, 2], sizes = [16, 1], strides = [1, 1]} : vector<16x3xf32> to vector<16x1xf32>
    %143 = vector.broadcast %50 : f32 to vector<16x1xf32>
    %144 = arith.subf %142, %143 : vector<16x1xf32>
    %145 = vector.broadcast %51 : f32 to vector<16x1xf32>
    %146 = arith.mulf %145, %138 : vector<16x1xf32>
    %147 = vector.broadcast %52 : f32 to vector<16x1xf32>
    %148 = arith.mulf %147, %141 : vector<16x1xf32>
    %149 = arith.addf %146, %148 : vector<16x1xf32>
    %150 = vector.broadcast %53 : f32 to vector<16x1xf32>
    %151 = arith.mulf %150, %144 : vector<16x1xf32>
    %152 = arith.addf %149, %151 : vector<16x1xf32>
    %153 = vector.broadcast %54 : f32 to vector<16x1xf32>
    %154 = arith.mulf %153, %138 : vector<16x1xf32>
    %155 = vector.broadcast %55 : f32 to vector<16x1xf32>
    %156 = arith.mulf %155, %141 : vector<16x1xf32>
    %157 = arith.addf %154, %156 : vector<16x1xf32>
    %158 = vector.broadcast %56 : f32 to vector<16x1xf32>
    %159 = arith.mulf %158, %144 : vector<16x1xf32>
    %160 = arith.addf %157, %159 : vector<16x1xf32>
    %161 = vector.broadcast %57 : f32 to vector<16x1xf32>
    %162 = arith.mulf %161, %138 : vector<16x1xf32>
    %163 = vector.broadcast %58 : f32 to vector<16x1xf32>
    %164 = arith.mulf %163, %141 : vector<16x1xf32>
    %165 = arith.addf %162, %164 : vector<16x1xf32>
    %166 = vector.broadcast %59 : f32 to vector<16x1xf32>
    %167 = arith.mulf %166, %144 : vector<16x1xf32>
    %168 = arith.addf %165, %167 : vector<16x1xf32>
    %cst_22 = arith.constant 1.000000e+00 : f32
    %169 = vector.broadcast %cst_22 : f32 to vector<16x1xf32>
    %170 = arith.mulf %168, %169 : vector<16x1xf32>
    %171 = tpu.reciprocal %170 {approx = true} : vector<16x1xf32> -> vector<16x1xf32>
    %172 = arith.mulf %152, %171 : vector<16x1xf32>
    %173 = arith.mulf %160, %171 : vector<16x1xf32>
    %174 = arith.subf %135, %173 : vector<16x1xf32>
    %175 = arith.subf %96, %172 : vector<16x1xf32>
    %176 = arith.mulf %174, %175 : vector<16x1xf32>
    %177 = arith.subf %172, %134 : vector<16x1xf32>
    %178 = arith.subf %97, %173 : vector<16x1xf32>
    %179 = arith.mulf %177, %178 : vector<16x1xf32>
    %180 = arith.addf %176, %179 : vector<16x1xf32>
    %181 = math.absf %180 : vector<16x1xf32>
    %cst_23 = arith.constant 9.99999993E-9 : f32
    %182 = vector.broadcast %cst_23 : f32 to vector<16x1xf32>
    %183 = arith.cmpf ogt, %181, %182 : vector<16x1xf32>
    %cst_24 = arith.constant 1.000000e+00 : f32
    %184 = vector.broadcast %cst_24 : f32 to vector<16x1xf32>
    %185 = arith.select %183, %180, %184 : vector<16x1xi1>, vector<16x1xf32>
    %cst_25 = arith.constant 1.000000e+00 : f32
    %186 = vector.broadcast %cst_25 : f32 to vector<16x1xf32>
    %187 = arith.divf %186, %185 : vector<16x1xf32>
    %cst_26 = arith.constant 0.000000e+00 : f32
    %188 = vector.broadcast %cst_26 : f32 to vector<16x1xf32>
    %189 = arith.select %183, %187, %188 : vector<16x1xi1>, vector<16x1xf32>
    %190 = arith.subf %135, %173 : vector<16x1xf32>
    %191 = arith.mulf %190, %189 : vector<16x1xf32>
    %192 = arith.subf %172, %134 : vector<16x1xf32>
    %193 = arith.mulf %192, %189 : vector<16x1xf32>
    %194 = arith.mulf %191, %172 : vector<16x1xf32>
    %195 = arith.mulf %193, %173 : vector<16x1xf32>
    %196 = arith.addf %194, %195 : vector<16x1xf32>
    %cst_27 = arith.constant 0.000000e+00 : f32
    %197 = vector.broadcast %cst_27 : f32 to vector<16x1xf32>
    %198 = arith.subf %197, %196 : vector<16x1xf32>
    %199 = arith.subf %173, %97 : vector<16x1xf32>
    %200 = arith.mulf %199, %189 : vector<16x1xf32>
    %201 = arith.subf %96, %172 : vector<16x1xf32>
    %202 = arith.mulf %201, %189 : vector<16x1xf32>
    %203 = arith.mulf %200, %172 : vector<16x1xf32>
    %204 = arith.mulf %202, %173 : vector<16x1xf32>
    %205 = arith.addf %203, %204 : vector<16x1xf32>
    %cst_28 = arith.constant 0.000000e+00 : f32
    %206 = vector.broadcast %cst_28 : f32 to vector<16x1xf32>
    %207 = arith.subf %206, %205 : vector<16x1xf32>
    %cst_29 = arith.constant 1.000000e+00 : f32
    %208 = vector.broadcast %cst_29 : f32 to vector<16x1xf32>
    %209 = arith.divf %208, %92 : vector<16x1xf32>
    %cst_30 = arith.constant 1.000000e+00 : f32
    %210 = vector.broadcast %cst_30 : f32 to vector<16x1xf32>
    %211 = arith.divf %210, %130 : vector<16x1xf32>
    %cst_31 = arith.constant 1.000000e+00 : f32
    %212 = vector.broadcast %cst_31 : f32 to vector<16x1xf32>
    %213 = arith.divf %212, %168 : vector<16x1xf32>
    %214 = arith.subf %209, %213 : vector<16x1xf32>
    %215 = arith.mulf %191, %214 : vector<16x1xf32>
    %216 = arith.subf %211, %213 : vector<16x1xf32>
    %217 = arith.mulf %200, %216 : vector<16x1xf32>
    %218 = arith.addf %215, %217 : vector<16x1xf32>
    %219 = arith.subf %209, %213 : vector<16x1xf32>
    %220 = arith.mulf %193, %219 : vector<16x1xf32>
    %221 = arith.subf %211, %213 : vector<16x1xf32>
    %222 = arith.mulf %202, %221 : vector<16x1xf32>
    %223 = arith.addf %220, %222 : vector<16x1xf32>
    %224 = arith.subf %209, %213 : vector<16x1xf32>
    %225 = arith.mulf %198, %224 : vector<16x1xf32>
    %226 = arith.subf %211, %213 : vector<16x1xf32>
    %227 = arith.mulf %207, %226 : vector<16x1xf32>
    %228 = arith.addf %225, %227 : vector<16x1xf32>
    %229 = arith.addf %228, %213 : vector<16x1xf32>
    %cst_32 = arith.constant 0.000000e+00 : f32
    %230 = vector.broadcast %cst_32 : f32 to vector<16x1xf32>
    %231 = arith.select %183, %218, %230 : vector<16x1xi1>, vector<16x1xf32>
    %cst_33 = arith.constant 0.000000e+00 : f32
    %232 = vector.broadcast %cst_33 : f32 to vector<16x1xf32>
    %233 = arith.select %183, %223, %232 : vector<16x1xi1>, vector<16x1xf32>
    %cst_34 = arith.constant 0.000000e+00 : f32
    %234 = vector.broadcast %cst_34 : f32 to vector<16x1xf32>
    %235 = arith.select %183, %229, %234 : vector<16x1xi1>, vector<16x1xf32>
    %236 = tpu.iota {dimensions = array<i32: 1>} : vector<1x1024xi32>
    %237 = arith.sitofp %236 : vector<1x1024xi32> to vector<1x1024xf32>
    %cst_35 = arith.constant 3.125000e-02 : f32
    %238 = vector.broadcast %cst_35 : f32 to vector<1x1024xf32>
    %239 = arith.mulf %237, %238 : vector<1x1024xf32>
    %240 = math.floor %239 : vector<1x1024xf32>
    %cst_36 = arith.constant 3.200000e+01 : f32
    %241 = vector.broadcast %cst_36 : f32 to vector<1x1024xf32>
    %242 = arith.mulf %240, %241 : vector<1x1024xf32>
    %243 = arith.subf %237, %242 : vector<1x1024xf32>
    %cst_37 = arith.constant 2.000000e+00 : f32
    %244 = vector.broadcast %cst_37 : f32 to vector<1x1024xf32>
    %245 = arith.mulf %244, %243 : vector<1x1024xf32>
    %cst_38 = arith.constant 1.000000e+00 : f32
    %246 = vector.broadcast %cst_38 : f32 to vector<1x1024xf32>
    %247 = arith.addf %245, %246 : vector<1x1024xf32>
    %cst_39 = arith.constant 3.200000e+01 : f32
    %248 = vector.broadcast %cst_39 : f32 to vector<1x1024xf32>
    %249 = arith.subf %247, %248 : vector<1x1024xf32>
    %cst_40 = arith.constant 3.200000e+01 : f32
    %250 = vector.broadcast %cst_40 : f32 to vector<1x1024xf32>
    %251 = arith.divf %249, %250 : vector<1x1024xf32>
    %cst_41 = arith.constant 2.000000e+00 : f32
    %252 = vector.broadcast %cst_41 : f32 to vector<1x1024xf32>
    %253 = arith.mulf %252, %240 : vector<1x1024xf32>
    %cst_42 = arith.constant 1.000000e+00 : f32
    %254 = vector.broadcast %cst_42 : f32 to vector<1x1024xf32>
    %255 = arith.addf %253, %254 : vector<1x1024xf32>
    %cst_43 = arith.constant 3.200000e+01 : f32
    %256 = vector.broadcast %cst_43 : f32 to vector<1x1024xf32>
    %257 = arith.subf %255, %256 : vector<1x1024xf32>
    %cst_44 = arith.constant 0.000000e+00 : f32
    %258 = vector.broadcast %cst_44 : f32 to vector<1x1024xf32>
    %259 = arith.subf %258, %257 : vector<1x1024xf32>
    %cst_45 = arith.constant 3.200000e+01 : f32
    %260 = vector.broadcast %cst_45 : f32 to vector<1x1024xf32>
    %261 = arith.divf %259, %260 : vector<1x1024xf32>
    %262 = vector.broadcast %191 : vector<16x1xf32> to vector<16x1024xf32>
    %263 = vector.broadcast %251 : vector<1x1024xf32> to vector<16x1024xf32>
    %264 = arith.mulf %262, %263 : vector<16x1024xf32>
    %265 = vector.broadcast %193 : vector<16x1xf32> to vector<16x1024xf32>
    %266 = vector.broadcast %261 : vector<1x1024xf32> to vector<16x1024xf32>
    %267 = arith.mulf %265, %266 : vector<16x1024xf32>
    %268 = arith.addf %264, %267 : vector<16x1024xf32>
    %269 = vector.broadcast %198 : vector<16x1xf32> to vector<16x1024xf32>
    %270 = arith.addf %268, %269 : vector<16x1024xf32>
    %271 = vector.broadcast %200 : vector<16x1xf32> to vector<16x1024xf32>
    %272 = vector.broadcast %251 : vector<1x1024xf32> to vector<16x1024xf32>
    %273 = arith.mulf %271, %272 : vector<16x1024xf32>
    %274 = vector.broadcast %202 : vector<16x1xf32> to vector<16x1024xf32>
    %275 = vector.broadcast %261 : vector<1x1024xf32> to vector<16x1024xf32>
    %276 = arith.mulf %274, %275 : vector<16x1024xf32>
    %277 = arith.addf %273, %276 : vector<16x1024xf32>
    %278 = vector.broadcast %207 : vector<16x1xf32> to vector<16x1024xf32>
    %279 = arith.addf %277, %278 : vector<16x1024xf32>
    %cst_46 = arith.constant 1.000000e+00 : f32
    %280 = vector.broadcast %cst_46 : f32 to vector<16x1024xf32>
    %281 = arith.subf %280, %270 : vector<16x1024xf32>
    %282 = arith.subf %281, %279 : vector<16x1024xf32>
    %283 = vector.broadcast %231 : vector<16x1xf32> to vector<16x1024xf32>
    %284 = vector.broadcast %251 : vector<1x1024xf32> to vector<16x1024xf32>
    %285 = arith.mulf %283, %284 : vector<16x1024xf32>
    %286 = vector.broadcast %233 : vector<16x1xf32> to vector<16x1024xf32>
    %287 = vector.broadcast %261 : vector<1x1024xf32> to vector<16x1024xf32>
    %288 = arith.mulf %286, %287 : vector<16x1024xf32>
    %289 = arith.addf %285, %288 : vector<16x1024xf32>
    %290 = vector.broadcast %235 : vector<16x1xf32> to vector<16x1024xf32>
    %291 = arith.addf %289, %290 : vector<16x1024xf32>
    %cst_47 = arith.constant 0.000000e+00 : f32
    %292 = vector.broadcast %cst_47 : f32 to vector<16x1024xf32>
    %293 = arith.cmpf oge, %270, %292 : vector<16x1024xf32>
    %cst_48 = arith.constant 0.000000e+00 : f32
    %294 = vector.broadcast %cst_48 : f32 to vector<16x1024xf32>
    %295 = arith.cmpf oge, %279, %294 : vector<16x1024xf32>
    %296 = arith.andi %293, %295 : vector<16x1024xi1>
    %cst_49 = arith.constant 0.000000e+00 : f32
    %297 = vector.broadcast %cst_49 : f32 to vector<16x1024xf32>
    %298 = arith.cmpf oge, %282, %297 : vector<16x1024xf32>
    %299 = arith.andi %296, %298 : vector<16x1024xi1>
    %cst_50 = arith.constant 0.00999999977 : f32
    %300 = vector.broadcast %cst_50 : f32 to vector<16x1024xf32>
    %301 = arith.cmpf ogt, %291, %300 : vector<16x1024xf32>
    %302 = arith.andi %299, %301 : vector<16x1024xi1>
    %cst_51 = arith.constant 1.000000e+01 : f32
    %303 = vector.broadcast %cst_51 : f32 to vector<16x1024xf32>
    %304 = arith.cmpf olt, %291, %303 : vector<16x1024xf32>
    %305 = arith.andi %302, %304 : vector<16x1024xi1>
    %cst_52 = arith.constant -1.000000e+00 : f32
    %306 = vector.broadcast %cst_52 : f32 to vector<16x1024xf32>
    %307 = arith.select %305, %291, %306 : vector<16x1024xi1>, vector<16x1024xf32>
    %cst_53 = arith.constant dense<0xFF800000> : vector<1024xf32>
    %308 = vector.multi_reduction <maximumf>, %307, %cst_53 [0] : vector<16x1024xf32> to vector<1024xf32>
    %309 = vector.shape_cast %308 : vector<1024xf32> to vector<1x1024xf32>
    %310 = vector.broadcast %309 : vector<1x1024xf32> to vector<16x1024xf32>
    %311 = arith.cmpf oeq, %307, %310 : vector<16x1024xf32>
    %312 = arith.andi %311, %305 : vector<16x1024xi1>
    %313 = arith.extui %312 : vector<16x1024xi1> to vector<16x1024xi32>
    %314 = arith.sitofp %313 : vector<16x1024xi32> to vector<16x1024xf32>
    %cst_54 = arith.constant dense<0.000000e+00> : vector<1024xf32>
    %315 = vector.multi_reduction <add>, %314, %cst_54 [0] : vector<16x1024xf32> to vector<1024xf32>
    %316 = vector.shape_cast %315 : vector<1024xf32> to vector<1x1024xf32>
    %cst_55 = arith.constant 1.000000e+00 : f32
    %317 = vector.broadcast %cst_55 : f32 to vector<1x1024xf32>
    %318 = arith.cmpf ogt, %316, %317 : vector<1x1024xf32>
    %cst_56 = arith.constant 1.000000e+00 : f32
    %319 = vector.broadcast %cst_56 : f32 to vector<1x1024xf32>
    %320 = arith.maximumf %316, %319 : vector<1x1024xf32>
    %cst_57 = arith.constant 1.000000e+00 : f32
    %321 = vector.broadcast %cst_57 : f32 to vector<1x1024xf32>
    %322 = arith.divf %321, %320 : vector<1x1024xf32>
    %cst_58 = arith.constant 1.000000e+00 : f32
    %323 = vector.broadcast %cst_58 : f32 to vector<1x1024xf32>
    %324 = arith.select %318, %322, %323 : vector<1x1024xi1>, vector<1x1024xf32>
    %325 = vector.broadcast %47 : vector<16x1xf32> to vector<16x1024xf32>
    %326 = arith.mulf %314, %325 : vector<16x1024xf32>
    %cst_59 = arith.constant dense<0.000000e+00> : vector<3x1024xf32>
    %327 = tpu.matmul %4, %326, %cst_59 {dimension_numbers = #tpu.dot_dimension_numbers<[1], [0], [0], [1], [0, 0, 1, 1], [], []>, precision = #tpu.contract_precision<fp32>} : vector<3x16xf32>, vector<16x1024xf32>, vector<3x1024xf32> -> vector<3x1024xf32>
    %328 = vector.broadcast %324 : vector<1x1024xf32> to vector<3x1024xf32>
    %329 = arith.mulf %327, %328 : vector<3x1024xf32>
    %c0_60 = arith.constant 0 : index
    %c0_61 = arith.constant 0 : index
    %330 = vector.load %arg6[%c0_60, %c0_61] : memref<3x1024xf32, #tpu.memory_space<vmem>>, vector<3x1024xf32>
    tpu.vector_store %arg6[%c0_60, %c0_61], %329 {strides = array<i32>} : memref<3x1024xf32, #tpu.memory_space<vmem>>, vector<3x1024xf32>,
    return
  }
}

</mosaic_0001>

<bundles_post_ra>
// kernel: neural_renderer_forward.1
= control target key start
LH: loop header
LB: loop body
LE: loop exit
PB: predicated region body
PF: predicated region fallthrough
CT: control target
= control target key end

     0   :  { %11 = vsyncpa [#allocation3], 0  ;;  %s5179_s0 = inlined_call_operand.vmem [shape: f32[3,16,64], index: 0, kind: input, shape index: {}]   ;;  %s5180_s1 = inlined_call_operand.vmem [shape: f32[16,3], index: 1, kind: input, shape index: {}]   ;;  %s5181_s2 = inlined_call_operand.vmem [shape: f32[16,3], index: 2, kind: input, shape index: {}]   ;;  %s5182_s3 = inlined_call_operand.vmem [shape: f32[16,3], index: 3, kind: input, shape index: {}]   ;;  %s5183_s4 = inlined_call_operand.vmem [shape: f32[3], index: 4, kind: input, shape index: {}]   ;;  %s5184_s5 = inlined_call_operand.vmem [shape: f32[9], index: 5, kind: input, shape index: {}]   ;;  %s5185_s6 = inlined_call_operand.vmem [shape: f32[3,1024], index: 6, kind: output, shape index: {}]  }
   0x1   :  { %s27_s23 = sshll.u32 %s5183_s4, 4  ;;  %s28_s23 = int_to_ptr.vmem [resolvable:$true] %s27_s23 }
   0x2   :  { %12 = vsyncpa [#allocation5], 0  ;;  %s37_s26 = sshll.u32 %s5184_s5, 4  ;;  %s3579_s27 = scalar_lea.vmem %s28_s23, 16  ;;  %s38_s26 = int_to_ptr.vmem [resolvable:$true] %s37_s26 }
   0x3   :  { %p3580_p0 = scmp.ne.s32.totalorder %s28_s23, %s3579_s27  ;;  %p3584_p1 = scmp.lt.s32.totalorder %s28_s23, %s28_s23 }
   0x4   :  { %p3585_p2 = scmp.lt.s32.totalorder %s3579_s27, %s3579_s27 }
   0x6   :  { %p3586_p3 = por %p3585_p2, %p3584_p1 }
   0x8   :  { %p3587_p4 = pnand %p3586_p3, %p3580_p0 }
   0xa   :  { %3590 = shalt.err (!%p3587_p4)
}
   0xb   :  { %s3607_s28 = smov [#allocation2]   ;;  %s3591_s29 = scalar_lea.vmem %s38_s26, 16 }
   0xc   :  { %30 = dma.vmem_to_smem %s28_s23, 16, %s3607_s28, [#allocation3]  }
   0xd   :  { %p3592_p5 = scmp.ne.s32.totalorder %s38_s26, %s3591_s29  ;;  %p3596_p6 = scmp.lt.s32.totalorder %s38_s26, %s38_s26 }
   0xe   :  { %p3597_p7 = scmp.lt.s32.totalorder %s3591_s29, %s3591_s29 }
  0x10   :  { %p3598_p8 = por %p3597_p7, %p3596_p6 }
  0x12   :  { %p3599_p9 = pnand %p3598_p8, %p3592_p5 }
  0x14   :  { %3602 = shalt.err (!%p3599_p9)
}
  0x15   :  { %s3608_s4 = smov [#allocation4]  }
  0x16   :  { %40 = dma.vmem_to_smem %s38_s26, 16, %s3608_s4, [#allocation5]  }
  0x17   :  { %3603 = dma.done.wait [#allocation3], 16  }
  0x18   :  { %3604 = vsyncadd [#allocation3], 4294967280 }
  0x19   :  { %3605 = dma.done.wait [#allocation5], 16  }
  0x1a   :  { %3606 = vsyncadd [#allocation5], 4294967280 }
  0x1b   :  { %47 = sfence }
  0x1c   :  { %v3660_v0 = vld [vmem:[%s5180_s1 + $0x8] sm:$0xff]  ;;  %v3670_v2 = vld [vmem:[%s5180_s1] sm:$0xff]  ;;  %s3476_s1 = sld [smem:[#allocation2 + $0x1]]  ;;  %s3611_s19 = smov 2   ;;  %vm60_vm2 = vcmask 523264  }
  0x1d   :  { %v3665_v1 = vld [vmem:[%s5181_s2 + $0x8] sm:$0xff]  ;;  %v3677_v4 = vld [vmem:[%s5181_s2] sm:$0xff]  ;;  %s3609_s2 = smov 126   ;;  %s3484_s17 = sld [smem:[#allocation4 + $0x7]] }
  0x1e   :  { %v93_v3 = vsub.f32 %v3660_v0, %v3665_v1  ;;  %v3682_v5 = vld [vmem:[%s5182_s3 + $0x8] sm:$0xff]  ;;  %v3687_v6 = vld [vmem:[%s5182_s3] sm:$0xff]  ;;  %v92_v7 = vsub.f32 %v3670_v2, %v3677_v4  ;;  %s3610_s3 = smov 1   ;;  %s3477_s18 = sld [smem:[#allocation2 + $0x2]] }
  0x1f   :  { %v3693_v8 = vsub.f32 %v3682_v5, %v3665_v1  ;;  %v3697_v9 = vsub.f32 %v3687_v6, %v3677_v4  ;;  %s3485_s20 = sld [smem:[#allocation4 + $0x8]]  ;;  %s3612_s21 = smov 127  }
  0x20   :  { %134 = vrot.lane.b32.xlu0 %v93_v3, %s3609_s2  ;;  %132 = vrot.lane.b32.xlu1 %v92_v7, %s3609_s2  ;;  %s3479_s22 = sld [smem:[#allocation4 + $0x2]] }
  0x21   :  { %s3482_s23 = sld [smem:[#allocation4 + $0x5]] }
  0x22   :  { %v225_v10 = vstv %s3476_s1  ;;  %s3478_s24 = sld [smem:[#allocation4 + $0x1]] }
  0x23   :  { %v227_v11 = vsub.f32 %v3660_v0, %v225_v10  ;;  %v292_v12 = vstv %s3484_s17  ;;  %v327_v14 = vsub.f32 %v3665_v1, %v225_v10  ;;  %v226_v15 = vsub.f32 %v3670_v2, %v225_v10  ;;  %s3481_s25 = sld [smem:[#allocation4 + $0x4]] }
  0x24   :  { %108 = vrot.lane.b32.xlu0 %v93_v3, %s3610_s3  ;;  %106 = vrot.lane.b32.xlu1 %v92_v7, %s3610_s3  ;;  %v417_v17 = vsub.f32 %v3682_v5, %v225_v10  ;;  %v228_v18 = vstv %s3477_s18  ;;  %v326_v20 = vsub.f32 %v3677_v4, %v225_v10  ;;  %v416_v35 = vsub.f32 %v3687_v6, %v225_v10  ;;  %s210_s26 = sld [smem:[#allocation2]] }
  0x25   :  { %v294_v13 = vmul.f32 %v292_v12, %v227_v11  ;;  %v385_v16 = vmul.f32 %v327_v14, %v292_v12  ;;  %v293_v19 = vmul.f32 %v292_v12, %v226_v15  ;;  %v3714_v21 = vsub.f32 %v3660_v0, %v228_v18  ;;  %s3483_s27 = sld [smem:[#allocation4 + $0x6]] }
  0x26   :  { %v3717_v22 = vsub.f32 %v3687_v6, %v228_v18  ;;  %v475_v23 = vmul.f32 %v417_v17, %v292_v12  ;;  %v329_v24 = vsub.f32 %v3665_v1, %v228_v18  ;;  %v419_v25 = vsub.f32 %v3682_v5, %v228_v18  ;;  %s213_s28 = sld [smem:[#allocation4]] }
  0x27   :  { %v3722_v26 = vstv %s3479_s22  ;;  %v305_v27 = vstv %s3485_s20  ;;  %v3724_v28 = vstv %s3482_s23  ;;  %v384_v34 = vmul.f32 %v326_v20, %v292_v12  ;;  %s3480_s29 = sld [smem:[#allocation4 + $0x3]] }
  0x28   :  { %126 = vrot.lane.b32.xlu0 %v93_v3, %s3611_s19  ;;  %100 = vrot.lane.b32.xlu1 %v93_v3, %s3612_s21  ;;  %v3728_v29 = vmul.f32 %v3717_v22, %v3722_v26  ;;  %v3731_v30 = vmul.f32 %v329_v24, %v3722_v26  ;;  %v3734_v31 = vmul.f32 %v329_v24, %v3724_v28  ;;  %v234_v43 = vstv %s3478_s24 }
  0x29   :  { %v3737_v32 = vmul.f32 %v419_v25, %v3722_v26  ;;  %v3740_v33 = vmul.f32 %v419_v25, %v3724_v28  ;;  %v307_v36 = vmul.f32 %v305_v27, %v3714_v21  ;;  %v474_v37 = vmul.f32 %v416_v35, %v292_v12 }
  0x2a   :  { %v229_v38 = vsub.f32 %v3670_v2, %v228_v18  ;;  %v397_v39 = vmul.f32 %v329_v24, %v305_v27  ;;  %v328_v41 = vsub.f32 %v3677_v4, %v228_v18  ;;  %v487_v42 = vmul.f32 %v419_v25, %v305_v27 }
  0x2b   :  { %v236_v45 = vmul.f32 %v234_v43, %v227_v11  ;;  %v263_v46 = vstv %s3481_s25  ;;  %v486_v47 = vmul.f32 %v3717_v22, %v305_v27  ;;  %v235_v49 = vmul.f32 %v234_v43, %v226_v15 }
  0x2c   :  { %124 = vrot.lane.b32.xlu0 %v92_v7, %s3611_s19  ;;  %299 = vrot.lane.b32.xlu1 %v294_v13, %s3612_s21  ;;  %v306_v40 = vmul.f32 %v305_v27, %v229_v38  ;;  %v396_v44 = vmul.f32 %v328_v41, %v305_v27  ;;  %v265_v48 = vmul.f32 %v263_v46, %v227_v11  ;;  %v3779_v10 = vstv %s210_s26 }
  0x2d   :  { %v333_v50 = vmul.f32 %v327_v14, %v234_v43  ;;  %v264_v51 = vmul.f32 %v263_v46, %v226_v15  ;;  %v359_v52 = vmul.f32 %v327_v14, %v263_v46  ;;  %v332_v53 = vmul.f32 %v326_v20, %v234_v43 }
  0x2e   :  { %v423_v54 = vmul.f32 %v417_v17, %v234_v43  ;;  %v358_v55 = vmul.f32 %v326_v20, %v263_v46  ;;  %v449_v56 = vmul.f32 %v417_v17, %v263_v46  ;;  %v422_v57 = vmul.f32 %v416_v35, %v234_v43 }
  0x2f   :  { %v249_v58 = vmul.f32 %v3722_v26, %v3714_v21  ;;  %v448_v59 = vmul.f32 %v416_v35, %v263_v46  ;;  %v248_v60 = vmul.f32 %v3722_v26, %v229_v38  ;;  %v277_v61 = vmul.f32 %v3724_v28, %v229_v38 }
  0x30   :  { %98 = vrot.lane.b32.xlu0 %v92_v7, %s3612_s21  ;;  %390 = vrot.lane.b32.xlu1 %v385_v16, %s3612_s21  ;;  %v344_v12 = vmul.f32 %v328_v41, %v3722_v26  ;;  %v3786_v15 = vsub.f32 %v3660_v0, %v3779_v10  ;;  %v3790_v17 = vstv %s3483_s27  ;;  %v370_v18 = vmul.f32 %v328_v41, %v3724_v28 }
  0x31   :  { %v278_v25 = vmul.f32 %v3724_v28, %v3714_v21 }
  0x32   :  { %v291_v0 = vmul.f32 %v3790_v17, %v3786_v15 }
  0x34   :  { %297 = vrot.lane.b32.xlu0 %v293_v19, %s3612_s21  ;;  %480 = vrot.lane.b32.xlu1 %v475_v23, %s3612_s21 }
  0x38   :  { %388 = vrot.lane.b32.xlu0 %v384_v34, %s3612_s21  ;;  %312 = vrot.lane.b32.xlu1 %v307_v36, %s3609_s2 }
  0x3c   :  { %478 = vrot.lane.b32.xlu0 %v474_v37, %s3612_s21  ;;  %402 = vrot.lane.b32.xlu1 %v397_v39, %s3609_s2  ;;  %v3613_v39 = vmov 0  }
  0x3d   :  { %3527 = vset.pattern.permute.xlu0 %v3613_v39  ;;  %3528 = vset.pattern.permute.xlu1 %v3613_v39  ;;  %v260_v39 = vstv %s3480_s29 }
  0x40   :  { %310 = vrot.lane.b32.xlu0 %v306_v40, %s3609_s2  ;;  %492 = vrot.lane.b32.xlu1 %v487_v42, %s3609_s2 }
  0x44   :  { %400 = vrot.lane.b32.xlu0 %v396_v44, %s3609_s2  ;;  %241 = vrot.lane.b32.xlu1 %v236_v45, %s3612_s21 }
  0x48   :  { %490 = vrot.lane.b32.xlu0 %v486_v47, %s3609_s2  ;;  %270 = vrot.lane.b32.xlu1 %v265_v48, %s3612_s21 }
  0x4c   :  { %239 = vrot.lane.b32.xlu0 %v235_v49, %s3612_s21  ;;  %338 = vrot.lane.b32.xlu1 %v333_v50, %s3612_s21 }
  0x50   :  { %268 = vrot.lane.b32.xlu0 %v264_v51, %s3612_s21  ;;  %364 = vrot.lane.b32.xlu1 %v359_v52, %s3612_s21 }
  0x54   :  { %336 = vrot.lane.b32.xlu0 %v332_v53, %s3612_s21  ;;  %428 = vrot.lane.b32.xlu1 %v423_v54, %s3612_s21 }
  0x58   :  { %362 = vrot.lane.b32.xlu0 %v358_v55, %s3612_s21  ;;  %454 = vrot.lane.b32.xlu1 %v449_v56, %s3612_s21 }
  0x5c   :  { %426 = vrot.lane.b32.xlu0 %v422_v57, %s3612_s21  ;;  %254 = vrot.lane.b32.xlu1 %v249_v58, %s3609_s2 }
  0x60   :  { %452 = vrot.lane.b32.xlu0 %v448_v59, %s3612_s21 }
  0x64   :  { %252 = vrot.lane.b32.xlu0 %v248_v60, %s3609_s2  ;;  %v223_v60 = vsub.f32 %v3670_v2, %v3779_v10  ;;  %v3864_v2 = vsub.f32 %v3665_v1, %v3779_v10 }
  0x68   :  { %281 = vrot.lane.b32.xlu0 %v277_v61, %s3609_s2  ;;  %v324_v61 = vsub.f32 %v3677_v4, %v3779_v10  ;;  %v3868_v4 = vsub.f32 %v3682_v5, %v3779_v10 }
  0x92   :  { %v135_v62 = vpop.permute.xlu0 %134  ;;  %v133_v3 = vpop.permute.xlu1 %132 }
  0x93   :  { %v139_v63 = vmul.f32 %v135_v62, %v3693_v8  ;;  %v138_v7 = vmul.f32 %v133_v3, %v3697_v9  ;;  %v290_v3 = vmul.f32 %v3790_v17, %v223_v60 }
  0x95   :  { %144 = vrot.lane.b32.xlu1 %v139_v63, %s3611_s19  ;;  %142 = vrot.lane.b32.xlu0 %v138_v7, %s3611_s19  ;;  %v414_v63 = vsub.f32 %v3687_v6, %v3779_v10  ;;  %v382_v7 = vmul.f32 %v324_v61, %v3790_v17 }
  0x96   :  { %v109_v11 = vpop.permute.xlu0 %108  ;;  %v107_v14 = vpop.permute.xlu1 %106 }
  0x97   :  { %v113_v13 = vmul.f32 %v109_v11, %v3693_v8  ;;  %v112_v16 = vmul.f32 %v107_v14, %v3697_v9  ;;  %v472_v11 = vmul.f32 %v414_v63, %v3790_v17 }
  0x99   :  { %118 = vrot.lane.b32.xlu1 %v113_v13, %s3612_s21  ;;  %348 = vrot.lane.b32.xlu0 %v344_v12, %s3609_s2 }
  0x9a   :  { %v127_v19 = vpop.permute.xlu0 %126  ;;  %v101_v23 = vpop.permute.xlu1 %100 }
  0x9b   :  { %v3795_v20 = vmul.f32 %v127_v19, %v3693_v8  ;;  %v3798_v24 = vmul.f32 %v101_v23, %v3693_v8  ;;  %v460_v8 = vmul.f32 %v3717_v22, %v3724_v28 }
  0x9d   :  { %116 = vrot.lane.b32.xlu1 %v112_v16, %s3612_s21  ;;  %374 = vrot.lane.b32.xlu0 %v370_v18, %s3609_s2 }
  0x9e   :  { %v125_v26 = vpop.permute.xlu0 %124  ;;  %v300_v34 = vpop.permute.xlu1 %299 }
  0x9f   :  { %v3807_v27 = vmul.f32 %v125_v26, %v3697_v9  ;;  %v304_v35 = vadd.f32 %v300_v34, %v291_v0  ;;  %v383_v0 = vmul.f32 %v3864_v2, %v3790_v17  ;;  %v473_v26 = vmul.f32 %v3868_v4, %v3790_v17 }
  0xa1   :  { %283 = vrot.lane.b32.xlu1 %v278_v25, %s3609_s2  ;;  %438 = vrot.lane.b32.xlu0 %v3728_v29, %s3609_s2 }
  0xa2   :  { %v99_v36 = vpop.permute.xlu0 %98  ;;  %v3817_v21 = vpop.permute.xlu1 %390 }
  0xa3   :  { %v3815_v37 = vmul.f32 %v99_v36, %v3697_v9 }
  0xa5   :  { %350 = vrot.lane.b32.xlu1 %v3731_v30, %s3609_s2  ;;  %464 = vrot.lane.b32.xlu0 %v460_v8, %s3609_s2 }
  0xa6   :  { %v3822_v38 = vpop.permute.xlu1 %480  ;;  %v298_v29 = vpop.permute.xlu0 %297 }
  0xa7   :  { %v303_v12 = vadd.f32 %v298_v29, %v290_v3  ;;  %v485_v36 = vadd.f32 %v3822_v38, %v473_v26 }
  0xa9   :  { %376 = vrot.lane.b32.xlu1 %v3734_v31, %s3609_s2 }
  0xaa   :  { %v313_v22 = vpop.permute.xlu1 %312  ;;  %v389_v41 = vpop.permute.xlu0 %388 }
  0xab   :  { %v317_v42 = vadd.f32 %v313_v22, %v304_v35  ;;  %v394_v14 = vadd.f32 %v389_v41, %v382_v7  ;;  %v395_v35 = vadd.f32 %v3817_v21, %v383_v0  ;;  %v261_v41 = vmul.f32 %v260_v39, %v223_v60 }
  0xad   :  { %440 = vrot.lane.b32.xlu1 %v3737_v32, %s3609_s2  ;;  %3531 = vrcp.f32 %v317_v42  ;;  %v3840_v32 = vstv %s213_s28 }
  0xae   :  { %v3828_v9 = vpop.permute.xlu1 %402  ;;  %v479_v31 = vpop.permute.xlu0 %478  ;;  %v233_v46 = vmul.f32 %v3840_v32, %v3786_v15  ;;  %v232_v10 = vmul.f32 %v3840_v32, %v223_v60  ;;  %v330_v29 = vmul.f32 %v324_v61, %v3840_v32  ;;  %v420_v42 = vmul.f32 %v414_v63, %v3840_v32 }
  0xaf   :  { %v484_v16 = vadd.f32 %v479_v31, %v472_v11 }
  0xb1   :  { %466 = vrot.lane.b32.xlu1 %v3740_v33, %s3609_s2 }
  0xb2   :  { %v3832_v28 = vpop.permute.xlu1 %492  ;;  %v311_v33 = vpop.permute.xlu0 %310 }
  0xb3   :  { %v316_v18 = vadd.f32 %v311_v33, %v303_v12  ;;  %v497_v21 = vadd.f32 %v3832_v28, %v485_v36 }
  0xb5   :  { %3533 = vrcp.f32 %v316_v18 }
  0xb6   :  { %v242_v30 = vpop.permute.xlu1 %241  ;;  %v401_v49 = vpop.permute.xlu0 %400 }
  0xb7   :  { %v246_v48 = vadd.f32 %v242_v30, %v233_v46  ;;  %v406_v6 = vadd.f32 %v401_v49, %v394_v14  ;;  %v262_v30 = vmul.f32 %v260_v39, %v3786_v15  ;;  %v446_v49 = vmul.f32 %v414_v63, %v260_v39 }
  0xb9   :  { %3535 = vrcp.f32 %v406_v6  ;;  %v421_v6 = vmul.f32 %v3868_v4, %v3840_v32 }
  0xba   :  { %v3834_v40 = vpop.permute.xlu1 %270  ;;  %v3848_v50 = vpop.eup %3531 }
  0xbb   :  { %v491_v54 = vpop.permute.xlu0 %490 }
  0xbc   :  { %v496_v23 = vadd.f32 %v491_v54, %v484_v16 }
  0xbe   :  { %v3836_v43 = vpop.permute.xlu1 %338  ;;  %3537 = vrcp.f32 %v496_v23 }
  0xbf   :  { %v240_v55 = vpop.permute.xlu0 %239 }
  0xc2   :  { %v3838_v44 = vpop.permute.xlu1 %364 }
  0xc3   :  { %v269_v56 = vpop.permute.xlu0 %268 }
  0xc4   :  { %v274_v15 = vadd.f32 %v269_v56, %v261_v41 }
  0xc6   :  { %v3842_v45 = vpop.permute.xlu1 %428 }
  0xc7   :  { %v337_v57 = vpop.permute.xlu0 %336  ;;  %v433_v36 = vadd.f32 %v3842_v45, %v421_v6 }
  0xc8   :  { %v342_v46 = vadd.f32 %v337_v57, %v330_v29 }
  0xca   :  { %v3846_v47 = vpop.permute.xlu1 %454 }
  0xcb   :  { %v363_v58 = vpop.permute.xlu0 %362 }
  0xce   :  { %v255_v51 = vpop.permute.xlu1 %254 }
  0xcf   :  { %v259_v52 = vadd.f32 %v255_v51, %v246_v48  ;;  %v427_v59 = vpop.permute.xlu0 %426  ;;  %v275_v48 = vadd.f32 %v3834_v40, %v262_v30 }
  0xd1   :  { %v3851_v53 = vmul.f32 %v3848_v50, %v259_v52  ;;  %v3895_v52 = vpop.eup %3533 }
  0xd2   :  { %v3897_v3 = vpop.eup %3535 }
  0xd3   :  { %v453_v62 = vpop.permute.xlu0 %452  ;;  %v3899_v57 = vpop.eup %3537 }
  0xd7   :  { %v253_v13 = vpop.permute.xlu0 %252 }
  0xdb   :  { %v282_v19 = vpop.permute.xlu0 %281 }
  0xdc   :  { %v287_v11 = vadd.f32 %v282_v19, %v274_v15 }
  0xde   :  { %v322_v19 = vmul.f32 %v3895_v52, %v287_v11  ;;  %v568_v11 = vsub.f32 %v3895_v52, %v3899_v57 }
 0x107   :  { %v145_v25 = vpop.permute.xlu1 %144  ;;  %v143_v34 = vpop.permute.xlu0 %142 }
 0x108   :  { %v3875_v1 = vsub.f32 %v3795_v20, %v145_v25  ;;  %v3878_v5 = vsub.f32 %v3807_v27, %v143_v34  ;;  %v245_v20 = vadd.f32 %v240_v55, %v232_v10  ;;  %v407_v27 = vadd.f32 %v3828_v9, %v395_v35 }
 0x109   :  { %v432_v9 = vadd.f32 %v427_v59, %v420_v42  ;;  %v357_v34 = vmul.f32 %v3864_v2, %v260_v39 }
 0x10a   :  { %v258_v51 = vadd.f32 %v253_v13, %v245_v20  ;;  %3539 = vrcp.f32 %v407_v27 }
 0x10b   :  { %v119_v8 = vpop.permute.xlu1 %118  ;;  %v349_v22 = vpop.permute.xlu0 %348  ;;  %3541 = vrcp.f32 %v497_v21  ;;  %v369_v41 = vadd.f32 %v3838_v44, %v357_v34 }
 0x10c   :  { %v3884_v17 = vsub.f32 %v3798_v24, %v119_v8  ;;  %v356_v24 = vmul.f32 %v324_v61, %v260_v39  ;;  %v354_v54 = vadd.f32 %v349_v22, %v342_v46  ;;  %v458_v61 = vadd.f32 %v453_v62, %v446_v49 }
 0x10d   :  { %v320_v40 = vmul.f32 %v3895_v52, %v258_v51  ;;  %v447_v22 = vmul.f32 %v3868_v4, %v260_v39 }
 0x10e   :  { %v410_v56 = vmul.f32 %v3897_v3, %v354_v54 }
 0x10f   :  { %v117_v31 = vpop.permute.xlu1 %116  ;;  %v375_v33 = vpop.permute.xlu0 %374 }
 0x110   :  { %v3892_v38 = vsub.f32 %v3815_v37, %v117_v31  ;;  %v368_v37 = vadd.f32 %v363_v58, %v356_v24  ;;  %v331_v58 = vmul.f32 %v3864_v2, %v3840_v32  ;;  %v459_v2 = vadd.f32 %v3846_v47, %v447_v22 }
 0x112   :  { %v380_v59 = vadd.f32 %v375_v33, %v368_v37  ;;  %v343_v26 = vadd.f32 %v3836_v43, %v331_v58  ;;  %v181_v37 = vmul.f32 0.0, %v3875_v1 }
 0x113   :  { %v284_v55 = vpop.permute.xlu1 %283  ;;  %v439_v60 = vpop.permute.xlu0 %438 }
 0x114   :  { %v288_v28 = vadd.f32 %v284_v55, %v275_v48  ;;  %v444_v7 = vadd.f32 %v439_v60, %v432_v9  ;;  %v412_v23 = vmul.f32 %v3897_v3, %v380_v59  ;;  %v153_v48 = vmul.f32 %v3875_v1, %v3875_v1  ;;  %v49_v1 = vld [vmem:[%s5179_s0 + $0x8] sm:$0xff] }
 0x116   :  { %v3903_v63 = vmul.f32 %v3848_v50, %v288_v28  ;;  %v3907_v12 = vmul.f32 %v3899_v57, %v444_v7 }
 0x117   :  { %v351_v13 = vpop.permute.xlu1 %350  ;;  %v465_v14 = vpop.permute.xlu0 %464 }
 0x118   :  { %v510_v16 = vsub.f32 %v3907_v12, %v410_v56  ;;  %v470_v62 = vadd.f32 %v465_v14, %v458_v61  ;;  %v506_v18 = vsub.f32 %v320_v40, %v3907_v12  ;;  %v355_v29 = vadd.f32 %v351_v13, %v343_v26  ;;  %v3922_v27 = vpop.eup %3539 }
 0x119   :  { %v3925_v31 = vpop.eup %3541 }
 0x11a   :  { %v502_v0 = vmul.f32 %v3899_v57, %v470_v62  ;;  %v411_v21 = vmul.f32 %v3922_v27, %v355_v29 }
 0x11b   :  { %v377_v25 = vpop.permute.xlu1 %376 }
 0x11c   :  { %v504_v10 = vsub.f32 %v412_v23, %v502_v0  ;;  %v512_v35 = vsub.f32 %v322_v19, %v502_v0  ;;  %v542_v8 = vsub.f32 %v502_v0, %v322_v19  ;;  %v381_v33 = vadd.f32 %v377_v25, %v369_v41 }
 0x11e   :  { %v508_v20 = vmul.f32 %v506_v18, %v504_v10  ;;  %v514_v30 = vmul.f32 %v512_v35, %v510_v16  ;;  %v413_v47 = vmul.f32 %v3922_v27, %v381_v33 }
 0x11f   :  { %v441_v32 = vpop.permute.xlu1 %440 }
 0x120   :  { %v445_v42 = vadd.f32 %v441_v32, %v433_v36  ;;  %v516_v43 = vadd.f32 %v514_v30, %v508_v20  ;;  %v569_v32 = vsub.f32 %v3848_v50, %v3925_v31 }
 0x122   :  { %v3930_v45 = vmul.f32 %v3925_v31, %v445_v42  ;;  %v518_v39 = vand.u32 2147483647, %v516_v43 }
 0x123   :  { %v467_v4 = vpop.permute.xlu1 %466 }
 0x124   :  { %v507_v46 = vsub.f32 %v3851_v53, %v3930_v45  ;;  %v471_v24 = vadd.f32 %v467_v4, %v459_v2  ;;  %v511_v44 = vsub.f32 %v3930_v45, %v411_v21  ;;  %vm3935_vm0 = vcmp.gt.f32.partialorder %v518_v39, 1e-08 }
 0x125   :  { %v522_v51 = vsel %vm3935_vm0, %v516_v43, 1.0  ;;  %v573_v43 = vsub.f32 %v3922_v27, %v3925_v31 }
 0x126   :  { %v503_v49 = vmul.f32 %v3925_v31, %v471_v24  ;;  %3543 = vrcp.f32 %v522_v51 }
 0x128   :  { %v505_v15 = vsub.f32 %v413_v47, %v503_v49  ;;  %v513_v9 = vsub.f32 %v3903_v63, %v503_v49  ;;  %v543_v53 = vsub.f32 %v503_v49, %v3903_v63  ;;  %v572_v63 = vsub.f32 %v3897_v3, %v3899_v57 }
 0x12a   :  { %v509_v54 = vmul.f32 %v507_v46, %v505_v15  ;;  %v515_v55 = vmul.f32 %v513_v9, %v511_v44 }
 0x12c   :  { %v517_v60 = vadd.f32 %v515_v55, %v509_v54 }
 0x12e   :  { %v519_v28 = vand.u32 2147483647, %v517_v60 }
 0x130   :  { %vm3945_vm1 = vcmp.gt.f32.partialorder %v519_v28, 1e-08 }
 0x131   :  { %v523_v7 = vsel %vm3945_vm1, %v517_v60, 1.0 }
 0x132   :  { %3545 = vrcp.f32 %v523_v7 }
 0x133   :  { %v3544_v61 = vpop.eup %3543  ;;  %3547 = vtanh.f32 %v49_v1 }
 0x134   :  { %v528_v40 = vsel %vm3935_vm0, %v3544_v61, 0.0 }
 0x135   :  { %v530_v56 = vmul.f32 %v528_v40, %v504_v10  ;;  %v532_v59 = vmul.f32 %v528_v40, %v510_v16  ;;  %v544_v13 = vmul.f32 %v542_v8, %v528_v40  ;;  %v546_v58 = vmul.f32 %v528_v40, %v506_v18 }
 0x136   :  { %v152_v40 = vmul.f32 %v3878_v5, %v3878_v5 }
 0x137   :  { %722 = vperm.xlu0 %3527, %v530_v56   ;;  %v534_v14 = vmul.f32 %v530_v56, %v3907_v12  ;;  %v536_v62 = vmul.f32 %v532_v59, %v502_v0  ;;  %v570_v6 = vmul.f32 %v568_v11, %v530_v56  ;;  %v574_v19 = vmul.f32 %v572_v63, %v544_v13 }
 0x138   :  { %v578_v23 = vmul.f32 %v568_v11, %v532_v59  ;;  %v580_v25 = vmul.f32 %v572_v63, %v546_v58  ;;  %v548_v26 = vmul.f32 %v544_v13, %v3907_v12  ;;  %v550_v34 = vmul.f32 %v546_v58, %v502_v0 }
 0x139   :  { %v538_v35 = vadd.f32 %v536_v62, %v534_v14  ;;  %v576_v52 = vadd.f32 %v574_v19, %v570_v6  ;;  %v3614_v56 = vmov 1   ;;  %v53_v62 = vld [vmem:[%s5179_s0 + $0x28] sm:$0xff]  ;;  %v5187_v6 = vmov 0.0  }
 0x13a   :  { %v3959_v36 = vadd.f32 %v580_v25, %v578_v23  ;;  %v3961_v3 = vadd.f32 %v550_v34, %v548_v26  ;;  %1546 = vmatprep.mubr.f32.mxu0 %v5187_v6  ;;  %1642 = vmatprep.mubr.f32.mxu1 %v5187_v6  ;;  %v5186_v25 = vlaneseq }
 0x13b   :  { %v540_v16 = vsub.f32 0.0, %v538_v35  ;;  %v592_v18 = vsel %vm3935_vm0, %v576_v52, 0.0 }
 0x13c   :  { %v594_v10 = vsel %vm3935_vm0, %v3959_v36, 0.0  ;;  %v554_v8 = vsub.f32 0.0, %v3961_v3  ;;  %v4036_v52 = vand.u32 127, %v5186_v25 }
 0x13d   :  { %v584_v22 = vmul.f32 %v568_v11, %v540_v16  ;;  %v3998_v11 = vmul.f32 %v3884_v17, %v3884_v17 }
 0x13e   :  { %v586_v12 = vmul.f32 %v572_v63, %v554_v8  ;;  %v180_v63 = vmul.f32 0.0, %v3878_v5  ;;  %v50_v5 = vld [vmem:[%s5179_s0 + $0x10] sm:$0xff]  ;;  %5221 = vst [vmem:[#allocation8_spill] sm:$0xff] %v4036_v52 }
 0x13f   :  { %v3546_v29 = vpop.eup %3545  ;;  %3549 = vtanh.f32 %v50_v5 }
 0x140   :  { %v529_v0 = vsel %vm3945_vm1, %v3546_v29, 0.0  ;;  %v588_v2 = vadd.f32 %v586_v12, %v584_v22  ;;  %v3548_v14 = vpop.eup %3547  ;;  %v604_v22 = vadd.s32 640, %v4036_v52  ;;  %v603_v29 = vadd.s32 512, %v4036_v52 }
 0x141   :  { %v533_v20 = vmul.f32 %v529_v0, %v511_v44  ;;  %v531_v30 = vmul.f32 %v529_v0, %v505_v15  ;;  %v545_v41 = vmul.f32 %v543_v53, %v529_v0  ;;  %v547_v42 = vmul.f32 %v529_v0, %v507_v46 }
 0x142   :  { %v590_v15 = vadd.f32 %v3899_v57, %v588_v2  ;;  %v64_v19 = vsel %vm60_vm2, %v3548_v14, 0.0  ;;  %v606_v12 = vadd.s32 896, %v4036_v52  ;;  %v612_v2 = vcvt.s32.f32 %v604_v22 }
 0x143   :  { %753 = vperm.xlu0 %3527, %v533_v20   ;;  %727 = vperm.xlu1 %3528, %v531_v30   ;;  %v535_v21 = vmul.f32 %v531_v30, %v3930_v45  ;;  %v537_v33 = vmul.f32 %v533_v20, %v503_v49  ;;  %v571_v4 = vmul.f32 %v569_v32, %v531_v30 }
 0x144   :  { %v575_v39 = vmul.f32 %v573_v43, %v545_v41  ;;  %v579_v24 = vmul.f32 %v569_v32, %v533_v20  ;;  %v581_v47 = vmul.f32 %v573_v43, %v547_v42  ;;  %v549_v51 = vmul.f32 %v545_v41, %v3930_v45 }
 0x145   :  { %v539_v50 = vadd.f32 %v537_v33, %v535_v21  ;;  %v551_v44 = vmul.f32 %v547_v42, %v503_v49  ;;  %v596_v54 = vsel %vm3935_vm0, %v590_v15, 0.0  ;;  %v611_v21 = vcvt.s32.f32 %v603_v29 }
 0x146   :  { %v577_v46 = vadd.f32 %v575_v39, %v571_v4  ;;  %v583_v9 = vadd.f32 %v581_v47, %v579_v24  ;;  %v614_v33 = vcvt.s32.f32 %v606_v12 }
 0x147   :  { %821 = vperm.xlu0 %3527, %v545_v41   ;;  %748 = vperm.xlu1 %3528, %v532_v59   ;;  %v541_v27 = vsub.f32 0.0, %v539_v50  ;;  %v553_v53 = vadd.f32 %v551_v44, %v549_v51  ;;  %v52_v59 = vld [vmem:[%s5179_s0 + $0x20] sm:$0xff]  ;;  %v607_v41 = vcvt.s32.f32 %v4036_v52  ;;  %v620_v44 = vmul.f32 0.03125, %v612_v2 }
 0x148   :  { %v593_v55 = vsel %vm3945_vm1, %v577_v46, 0.0  ;;  %v595_v60 = vsel %vm3945_vm1, %v583_v9, 0.0  ;;  %3551 = vtanh.f32 %v52_v59  ;;  %v619_v15 = vmul.f32 0.03125, %v611_v21 }
 0x149   :  { %v585_v45 = vmul.f32 %v569_v32, %v541_v27  ;;  %v555_v28 = vsub.f32 0.0, %v553_v53  ;;  %v605_v32 = vadd.s32 768, %v4036_v52  ;;  %v615_v47 = vmul.f32 0.03125, %v607_v41 }
 0x14a   :  { %v622_v46 = vmul.f32 0.03125, %v614_v33 }
 0x14b   :  { %847 = vperm.xlu0 %3527, %v547_v42   ;;  %816 = vperm.xlu1 %3528, %v544_v13   ;;  %v587_v57 = vmul.f32 %v573_v43, %v555_v28  ;;  %v48_v13 = vld [vmem:[%s5179_s0] sm:$0xff]  ;;  %v613_v39 = vcvt.s32.f32 %v605_v32  ;;  %v623_v53 = vfloor.f32 %v615_v47 }
 0x14c   :  { %3553 = vtanh.f32 %v48_v13  ;;  %v3550_v23 = vpop.eup %3549 }
 0x14d   :  { %v589_v49 = vadd.f32 %v587_v57, %v585_v45  ;;  %v67_v26 = vsel %vm60_vm2, %v3550_v23, 0.0  ;;  %v621_v9 = vmul.f32 0.03125, %v613_v39  ;;  %v627_v45 = vfloor.f32 %v619_v15 }
 0x14e   :  { %v680_v23 = vmul.f32 2.0, %v623_v53 }
 0x14f   :  { %196 = vrot.lane.b32.xlu0 %v3884_v17, %s3610_s3  ;;  %842 = vperm.xlu1 %3528, %v546_v58   ;;  %v591_v7 = vadd.f32 %v3925_v31, %v589_v49  ;;  %v4005_v31 = vmul.f32 %v3892_v38, %v3892_v38  ;;  %v51_v58 = vld [vmem:[%s5179_s0 + $0x18] sm:$0xff]  ;;  %v629_v57 = vfloor.f32 %v621_v9 }
 0x150   :  { %3555 = vtanh.f32 %v51_v58 }
 0x151   :  { %v597_v61 = vsel %vm3945_vm1, %v591_v7, 0.0  ;;  %3557 = vtanh.f32 %v53_v62  ;;  %v631_v7 = vmul.f32 32.0, %v623_v53  ;;  %v686_v22 = vmul.f32 2.0, %v629_v57 }
 0x153   :  { %158 = vrot.lane.b32.xlu0 %v153_v48, %s3612_s21  ;;  %194 = vrot.lane.b32.xlu1 %v3892_v38, %s3610_s3  ;;  %v639_v5 = vsub.f32 %v607_v41, %v631_v7 }
 0x155   :  { %v3552_v34 = vpop.eup %3551 }
 0x156   :  { %v73_v36 = vsel %vm60_vm2, %v3552_v34, 0.0 }
 0x157   :  { %168 = vrot.lane.b32.xlu0 %v3998_v11, %s3610_s3  ;;  %156 = vrot.lane.b32.xlu1 %v152_v40, %s3612_s21 }
 0x159   :  { %v3554_v35 = vpop.eup %3553 }
 0x15a   :  { %v61_v3 = vsel %vm60_vm2, %v3554_v35, 0.0 }
 0x15b   :  { %166 = vrot.lane.b32.xlu1 %v4005_v31, %s3610_s3  ;;  %795 = vperm.xlu0 %3527, %v541_v27  }
 0x15f   :  { %790 = vperm.xlu1 %3528, %v540_v16   ;;  %947 = vperm.xlu0 %3527, %v593_v55   ;;  %v3556_v16 = vpop.eup %3555 }
 0x160   :  { %v70_v0 = vsel %vm60_vm2, %v3556_v16, 0.0  ;;  %v3558_v20 = vpop.eup %3557 }
 0x161   :  { %v76_v4 = vsel %vm60_vm2, %v3558_v20, 0.0 }
 0x163   :  { %942 = vperm.xlu1 %3528, %v592_v18   ;;  %186 = vrot.lane.b32.xlu0 %v181_v37, %s3612_s21  ;;  %v600_v18 = vadd.s32 128, %v4036_v52  ;;  %v635_v37 = vmul.f32 32.0, %v627_v45 }
 0x165   :  { %v608_v30 = vcvt.s32.f32 %v600_v18  ;;  %v643_v14 = vsub.f32 %v611_v21, %v635_v37 }
 0x167   :  { %184 = vrot.lane.b32.xlu1 %v180_v63, %s3612_s21  ;;  %973 = vperm.xlu0 %3527, %v595_v60   ;;  %v616_v24 = vmul.f32 0.03125, %v608_v30  ;;  %v628_v60 = vfloor.f32 %v620_v44 }
 0x169   :  { %v624_v27 = vfloor.f32 %v616_v24  ;;  %v636_v40 = vmul.f32 32.0, %v628_v60  ;;  %v685_v35 = vmul.f32 2.0, %v628_v60 }
 0x16b   :  { %968 = vperm.xlu1 %3528, %v594_v10   ;;  %889 = vperm.xlu0 %3527, %v555_v28   ;;  %v602_v10 = vadd.s32 384, %v4036_v52  ;;  %v630_v28 = vfloor.f32 %v622_v46  ;;  %v632_v49 = vmul.f32 32.0, %v624_v27  ;;  %v644_v58 = vsub.f32 %v612_v2, %v636_v40 }
 0x16d   :  { %v610_v42 = vcvt.s32.f32 %v602_v10  ;;  %v638_v63 = vmul.f32 32.0, %v630_v28  ;;  %v640_v1 = vsub.f32 %v608_v30, %v632_v49  ;;  %v647_v10 = vmul.f32 2.0, %v639_v5 }
 0x16e   :  { %v652_v12 = vmul.f32 2.0, %v644_v58  ;;  %v688_v30 = vadd.f32 1.0, %v680_v23 }
 0x16f   :  { %884 = vperm.xlu1 %3528, %v554_v8   ;;  %1015 = vperm.xlu0 %3527, %v597_v61   ;;  %v601_v8 = vadd.s32 256, %v4036_v52  ;;  %v618_v51 = vmul.f32 0.03125, %v610_v42  ;;  %v646_v62 = vsub.f32 %v614_v33, %v638_v63  ;;  %v648_v18 = vmul.f32 2.0, %v640_v1 }
 0x170   :  { %v655_v24 = vadd.f32 1.0, %v647_v10  ;;  %v3494_v9 = vadd.f32 -32.0, %v688_v30 }
 0x171   :  { %v609_v43 = vcvt.s32.f32 %v601_v8  ;;  %v654_v32 = vmul.f32 2.0, %v646_v62 }
 0x173   :  { %1010 = vperm.xlu1 %3528, %v596_v54   ;;  %3529 = vset.pattern.permute.xlu0 %v3614_v56  ;;  %v617_v50 = vmul.f32 0.03125, %v609_v43  ;;  %v626_v54 = vfloor.f32 %v618_v51  ;;  %v662_v15 = vadd.f32 1.0, %v654_v32 }
 0x175   :  { %v625_v55 = vfloor.f32 %v617_v50  ;;  %v634_v48 = vmul.f32 32.0, %v626_v54  ;;  %v660_v50 = vadd.f32 1.0, %v652_v12  ;;  %v3493_v37 = vadd.f32 -32.0, %v662_v15 }
 0x177   :  { %3530 = vset.pattern.permute.xlu1 %v3614_v56  ;;  %v633_v61 = vmul.f32 32.0, %v625_v55  ;;  %v637_v56 = vmul.f32 32.0, %v629_v57  ;;  %v642_v59 = vsub.f32 %v610_v42, %v634_v48  ;;  %v682_v34 = vmul.f32 2.0, %v625_v55 }
 0x178   :  { %v3486_v57 = vadd.f32 -32.0, %v655_v24 }
 0x179   :  { %v641_v13 = vsub.f32 %v609_v43, %v633_v61  ;;  %v645_v16 = vsub.f32 %v613_v39, %v637_v56  ;;  %v650_v8 = vmul.f32 2.0, %v642_v59  ;;  %v690_v42 = vadd.f32 1.0, %v682_v34 }
 0x17a   :  { %v693_v43 = vadd.f32 1.0, %v685_v35  ;;  %v694_v39 = vadd.f32 1.0, %v686_v22  ;;  %v3491_v61 = vadd.f32 -32.0, %v660_v50  ;;  %v704_v56 = vsub.f32 0.0, %v3494_v9 }
 0x17b   :  { %v649_v29 = vmul.f32 2.0, %v641_v13  ;;  %v653_v33 = vmul.f32 2.0, %v645_v16  ;;  %v658_v47 = vadd.f32 1.0, %v650_v8  ;;  %v3496_v53 = vadd.f32 -32.0, %v690_v42 }
 0x17c   :  { %v3500_v7 = vadd.f32 -32.0, %v694_v39  ;;  %v4064_v16 = vmul.f32 0.03125, %v3493_v37  ;;  %v4068_v10 = vmul.f32 0.03125, %v704_v56 }
 0x17d   :  { %v657_v51 = vadd.f32 1.0, %v649_v29  ;;  %v3489_v49 = vadd.f32 -32.0, %v658_v47  ;;  %v706_v5 = vsub.f32 0.0, %v3496_v53 }
 0x17e   :  { %5226 = vst [vmem:[#allocation13_spill] sm:$0xff] %v4064_v16 }
 0x17f   :  { %v3488_v48 = vadd.f32 -32.0, %v657_v51  ;;  %v4054_v23 = vmul.f32 0.03125, %v3489_v49  ;;  %v4072_v22 = vmul.f32 0.03125, %v706_v5 }
 0x181   :  { %5222 = vst [vmem:[#allocation9_spill] sm:$0xff] %v4054_v23  ;;  %v4058_v35 = vmul.f32 0.03125, %v3488_v48  ;;  %5227 = vst [vmem:[#allocation14_spill] sm:$0xff] %v4072_v22 }
 0x183   :  { %5223 = vst [vmem:[#allocation10_spill] sm:$0xff] %v4058_v35 }
 0x18e   :  { %65 = vadd.xlane.f32.xlu0 %v64_v19  ;;  %v681_v19 = vmul.f32 2.0, %v624_v27 }
 0x190   :  { %v689_v20 = vadd.f32 1.0, %v681_v19  ;;  %v4052_v19 = vmul.f32 0.03125, %v3486_v57 }
 0x192   :  { %68 = vadd.xlane.f32.xlu0 %v67_v26  ;;  %v683_v26 = vmul.f32 2.0, %v626_v54  ;;  %v3495_v46 = vadd.f32 -32.0, %v689_v20  ;;  %v3499_v54 = vadd.f32 -32.0, %v693_v43 }
 0x194   :  { %v691_v41 = vadd.f32 1.0, %v683_v26  ;;  %v705_v63 = vsub.f32 0.0, %v3495_v46  ;;  %v709_v59 = vsub.f32 0.0, %v3499_v54  ;;  %v710_v26 = vsub.f32 0.0, %v3500_v7 }
 0x196   :  { %74 = vadd.xlane.f32.xlu0 %v73_v36  ;;  %v684_v36 = vmul.f32 2.0, %v627_v45  ;;  %v3497_v27 = vadd.f32 -32.0, %v691_v41  ;;  %v661_v45 = vadd.f32 1.0, %v653_v33  ;;  %v4074_v29 = vmul.f32 0.03125, %v709_v59 }
 0x197   :  { %62 = vadd.xlane.f32.xlu1 %v61_v3  ;;  %v687_v3 = vmul.f32 2.0, %v630_v28  ;;  %v4088_v42 = vmul.f32 0.03125, %v710_v26 }
 0x198   :  { %v692_v2 = vadd.f32 1.0, %v684_v36  ;;  %v707_v1 = vsub.f32 0.0, %v3497_v27  ;;  %v4060_v36 = vmul.f32 0.03125, %v3491_v61 }
 0x199   :  { %v695_v21 = vadd.f32 1.0, %v687_v3  ;;  %5231 = vst [vmem:[#allocation18_spill] sm:$0xff] %v4088_v42 }
 0x19a   :  { %v3498_v55 = vadd.f32 -32.0, %v692_v2  ;;  %5224 = vst [vmem:[#allocation11_spill] sm:$0xff] %v4060_v36  ;;  %v4070_v8 = vmul.f32 0.03125, %v707_v1 }
 0x19b   :  { %71 = vadd.xlane.f32.xlu1 %v70_v0  ;;  %v651_v0 = vmul.f32 2.0, %v643_v14  ;;  %v3501_v60 = vadd.f32 -32.0, %v695_v21  ;;  %v3492_v14 = vadd.f32 -32.0, %v661_v45 }
 0x19c   :  { %v708_v13 = vsub.f32 0.0, %v3498_v55 }
 0x19d   :  { %v659_v44 = vadd.f32 1.0, %v651_v0  ;;  %v711_v58 = vsub.f32 0.0, %v3501_v60  ;;  %v4080_v32 = vmul.f32 0.03125, %v3492_v14 }
 0x19e   :  { %v4076_v12 = vmul.f32 0.03125, %v708_v13 }
 0x19f   :  { %77 = vadd.xlane.f32.xlu1 %v76_v4  ;;  %v656_v4 = vadd.f32 1.0, %v648_v18  ;;  %v3490_v40 = vadd.f32 -32.0, %v659_v44  ;;  %v4066_v18 = vmul.f32 0.03125, %v705_v63  ;;  %v4078_v0 = vmul.f32 0.03125, %v711_v58  ;;  %5230 = vst [vmem:[#allocation17_spill] sm:$0xff] %v4080_v32 }
 0x1a0   :  { %5228 = vst [vmem:[#allocation15_spill] sm:$0xff] %v4076_v12 }
 0x1a1   :  { %v3487_v28 = vadd.f32 -32.0, %v656_v4  ;;  %v4062_v3 = vmul.f32 0.03125, %v3490_v40  ;;  %5229 = vst [vmem:[#allocation16_spill] sm:$0xff] %v4078_v0 }
 0x1a3   :  { %v4050_v62 = vmul.f32 0.03125, %v3487_v28  ;;  %5225 = vst [vmem:[#allocation12_spill] sm:$0xff] %v4062_v3 }
 0x1b2   :  { %v4056_v34 = vpop.permute.xlu0 %722 }
 0x1b3   :  { %v731_v20 = vmul.f32 %v4056_v34, %v4050_v62  ;;  %v730_v30 = vmul.f32 %v4056_v34, %v4052_v19  ;;  %v733_v41 = vmul.f32 %v4056_v34, %v4054_v23  ;;  %v732_v21 = vmul.f32 %v4056_v34, %v4058_v35 }
 0x1b4   :  { %v735_v33 = vmul.f32 %v4056_v34, %v4060_v36  ;;  %v734_v4 = vmul.f32 %v4056_v34, %v4062_v3  ;;  %v4102_v24 = vmul.f32 %v4056_v34, %v4064_v16 }
 0x1be   :  { %v4090_v43 = vpop.permute.xlu0 %753  ;;  %v4092_v2 = vpop.permute.xlu1 %727 }
 0x1bf   :  { %v739_v47 = vmul.f32 %v4092_v2, %v4050_v62  ;;  %v765_v39 = vmul.f32 %v4090_v43, %v4066_v18  ;;  %v738_v51 = vmul.f32 %v4092_v2, %v4052_v19  ;;  %v764_v50 = vmul.f32 %v4090_v43, %v4068_v10 }
 0x1c0   :  { %v741_v44 = vmul.f32 %v4092_v2, %v4054_v23  ;;  %v767_v15 = vmul.f32 %v4090_v43, %v4070_v8  ;;  %v740_v46 = vmul.f32 %v4092_v2, %v4058_v35  ;;  %v766_v9 = vmul.f32 %v4090_v43, %v4072_v22 }
 0x1c1   :  { %v4120_v27 = vadd.f32 %v765_v39, %v739_v47  ;;  %v4122_v53 = vadd.f32 %v764_v50, %v738_v51  ;;  %v743_v54 = vmul.f32 %v4092_v2, %v4060_v36  ;;  %v769_v55 = vmul.f32 %v4090_v43, %v4074_v29 }
 0x1c2   :  { %v4128_v60 = vpop.permute.xlu0 %821  ;;  %v4130_v45 = vpop.permute.xlu1 %748  ;;  %v4132_v28 = vadd.f32 %v767_v15, %v741_v44  ;;  %v4134_v57 = vadd.f32 %v766_v9, %v740_v46  ;;  %v742_v49 = vmul.f32 %v4092_v2, %v4062_v3  ;;  %v768_v7 = vmul.f32 %v4090_v43, %v4076_v12 }
 0x1c3   :  { %5232 = vst [vmem:[#allocation19_spill] sm:$0xff] %v4128_v60  ;;  %v757_v48 = vmul.f32 %v4130_v45, %v4066_v18  ;;  %v833_v61 = vmul.f32 %v4128_v60, %v4050_v62  ;;  %v756_v40 = vmul.f32 %v4130_v45, %v4068_v10  ;;  %v832_v37 = vmul.f32 %v4128_v60, %v4052_v19 }
 0x1c4   :  { %v759_v63 = vmul.f32 %v4130_v45, %v4070_v8  ;;  %v835_v56 = vmul.f32 %v4128_v60, %v4054_v23  ;;  %v758_v1 = vmul.f32 %v4130_v45, %v4072_v22  ;;  %v834_v5 = vmul.f32 %v4128_v60, %v4058_v35 }
 0x1c5   :  { %v4156_v59 = vadd.f32 %v757_v48, %v731_v20  ;;  %v4158_v13 = vadd.f32 %v756_v40, %v730_v30  ;;  %v761_v58 = vmul.f32 %v4130_v45, %v4074_v29  ;;  %v4162_v14 = vadd.f32 %v769_v55, %v743_v54 }
 0x1c6   :  { %v4164_v26 = vpop.permute.xlu0 %847  ;;  %v4166_v47 = vpop.permute.xlu1 %816  ;;  %v4168_v39 = vadd.f32 %v759_v63, %v733_v41  ;;  %v4170_v51 = vadd.f32 %v758_v1, %v732_v21  ;;  %v837_v50 = vmul.f32 %v4128_v60, %v4060_v36  ;;  %v760_v20 = vmul.f32 %v4130_v45, %v4076_v12 }
 0x1c7   :  { %5233 = vst [vmem:[#allocation20_spill] sm:$0xff] %v4164_v26  ;;  %v825_v30 = vmul.f32 %v4166_v47, %v4050_v62  ;;  %v859_v44 = vmul.f32 %v4164_v26, %v4066_v18  ;;  %v824_v15 = vmul.f32 %v4166_v47, %v4052_v19  ;;  %v858_v41 = vmul.f32 %v4164_v26, %v4068_v10 }
 0x1c8   :  { %v827_v21 = vmul.f32 %v4166_v47, %v4054_v23  ;;  %v861_v46 = vmul.f32 %v4164_v26, %v4070_v8  ;;  %v826_v9 = vmul.f32 %v4166_v47, %v4058_v35  ;;  %v860_v54 = vmul.f32 %v4164_v26, %v4072_v22 }
 0x1c9   :  { %v4192_v55 = vadd.f32 %v859_v44, %v833_v61  ;;  %v4194_v48 = vadd.f32 %v858_v41, %v832_v37  ;;  %v4196_v40 = vadd.f32 %v761_v58, %v735_v33  ;;  %v829_v63 = vmul.f32 %v4166_v47, %v4060_v36 }
 0x1ca   :  { %v4200_v1 = vpop.permute.xlu0 %196  ;;  %v843_v25 = vpop.permute.xlu1 %842  ;;  %v4202_v6 = vadd.f32 %v861_v46, %v835_v56  ;;  %v4204_v52 = vadd.f32 %v860_v54, %v834_v5  ;;  %v863_v35 = vmul.f32 %v4164_v26, %v4074_v29  ;;  %v4208_v23 = vadd.f32 %v760_v20, %v734_v4 }
 0x1cb   :  { %v851_v61 = vmul.f32 %v843_v25, %v4066_v18  ;;  %v850_v33 = vmul.f32 %v843_v25, %v4068_v10  ;;  %v853_v37 = vmul.f32 %v843_v25, %v4070_v8  ;;  %v852_v58 = vmul.f32 %v843_v25, %v4072_v22 }
 0x1cc   :  { %5234 = vst [vmem:[#allocation21_spill] sm:$0xff] %v4204_v52  ;;  %v855_v44 = vmul.f32 %v843_v25, %v4074_v29  ;;  %v4215_v41 = vadd.f32 %v863_v35, %v837_v50  ;;  %v784_v56 = vadd.f32 %v768_v7, %v742_v49  ;;  %v828_v5 = vmul.f32 %v4166_v47, %v4062_v3 }
 0x1cd   :  { %v4219_v46 = vadd.f32 %v851_v61, %v825_v30  ;;  %v4221_v4 = vadd.f32 %v850_v33, %v824_v15  ;;  %v4223_v20 = vadd.f32 %v853_v37, %v827_v21  ;;  %v4225_v54 = vadd.f32 %v852_v58, %v826_v9 }
 0x1ce   :  { %v159_v36 = vpop.permute.xlu0 %158  ;;  %v4227_v52 = vpop.permute.xlu1 %194  ;;  %v4229_v22 = vadd.f32 %v855_v44, %v829_v63  ;;  %v836_v35 = vmul.f32 %v4128_v60, %v4062_v3  ;;  %v854_v49 = vmul.f32 %v843_v25, %v4076_v12  ;;  %v862_v7 = vmul.f32 %v4164_v26, %v4076_v12 }
 0x1cf   :  { %v163_v50 = vadd.f32 %v159_v36, %v3998_v11  ;;  %v745_v30 = vmul.f32 %v4092_v2, %v4064_v16  ;;  %v763_v15 = vmul.f32 %v4130_v45, %v4078_v0  ;;  %v771_v21 = vmul.f32 %v4090_v43, %v4078_v0 }
 0x1d0   :  { %v4243_v9 = vadd.f32 %v854_v49, %v828_v5  ;;  %v4245_v63 = vadd.f32 %v862_v7, %v836_v35  ;;  %v831_v61 = vmul.f32 %v4166_v47, %v4064_v16  ;;  %v839_v33 = vmul.f32 %v4128_v60, %v4064_v16 }
 0x1d1   :  { %v4252_v11 = vadd.f32 %v763_v15, %v4102_v24  ;;  %v4254_v36 = vadd.f32 %v771_v21, %v745_v30  ;;  %v857_v37 = vmul.f32 %v843_v25, %v4078_v0  ;;  %v865_v58 = vmul.f32 %v4164_v26, %v4078_v0 }
 0x1d2   :  { %v169_v44 = vpop.permute.xlu0 %168  ;;  %v157_v5 = vpop.permute.xlu1 %156  ;;  %v736_v35 = vmul.f32 %v4056_v34, %v4080_v32  ;;  %v744_v49 = vmul.f32 %v4092_v2, %v4080_v32  ;;  %v762_v7 = vmul.f32 %v4130_v45, %v4088_v42  ;;  %v770_v24 = vmul.f32 %v4090_v43, %v4088_v42 }
 0x1d3   :  { %v173_v30 = vadd.f32 %v169_v44, %v163_v50  ;;  %v4267_v15 = vadd.f32 %v857_v37, %v831_v61  ;;  %v4269_v21 = vadd.f32 %v865_v58, %v839_v33  ;;  %v830_v34 = vmul.f32 %v4166_v47, %v4080_v32 }
 0x1d4   :  { %v4271_v16 = vadd.f32 %v762_v7, %v736_v35  ;;  %v4273_v0 = vadd.f32 %v770_v24, %v744_v49  ;;  %v856_v2 = vmul.f32 %v843_v25, %v4088_v42  ;;  %v162_v45 = vadd.f32 %v157_v5, %v4005_v31 }
 0x1d5   :  { %v175_v3 = vadd.f32 1e-10, %v173_v30  ;;  %v179_v37 = vmul.f32 0.0, %v3884_v17 }
 0x1d6   :  { %5235 = vst [vmem:[#allocation22_spill] sm:$0xff] %v4271_v16  ;;  %5236 = vst [vmem:[#allocation23_spill] sm:$0xff] %v4273_v0  ;;  %v167_v60 = vpop.permute.xlu1 %166  ;;  %v4279_v12 = vpop.permute.xlu0 %795  ;;  %v4281_v43 = vadd.f32 %v856_v2, %v830_v34 }
 0x1d7   :  { %3559 = vrsqrt.f32 %v175_v3  ;;  %v172_v50 = vadd.f32 %v167_v60, %v162_v45  ;;  %v4285_v61 = vadd.f32 %v4279_v12, %v4120_v27  ;;  %v4289_v33 = vadd.f32 %v4279_v12, %v4122_v53 }
 0x1d8   :  { %5237 = vst [vmem:[#allocation24_spill] sm:$0xff] %v4281_v43  ;;  %v4293_v25 = vadd.f32 %v4279_v12, %v4132_v28  ;;  %v4297_v31 = vadd.f32 %v4279_v12, %v4134_v57  ;;  %v4301_v3 = vadd.f32 %v4279_v12, %v4162_v14  ;;  %v4304_v60 = vadd.f32 %v4279_v12, %v784_v56 }
 0x1d9   :  { %v174_v27 = vadd.f32 1e-10, %v172_v50  ;;  %v917_v7 = vsub.f32 1.0, %v4285_v61  ;;  %vm1043_vm3 = vcmp.ge.f32.partialorder %v4285_v61, 0.0  ;;  %vm1042_vm4 = vcmp.ge.f32.partialorder %v4289_v33, 0.0 }
 0x1da   :  { %v4306_v47 = vpop.permute.xlu1 %790  ;;  %v4308_v53 = vpop.permute.xlu0 %947 }
 0x1db   :  { %3561 = vrsqrt.f32 %v174_v27  ;;  %v4312_v28 = vadd.f32 %v4306_v47, %v4156_v59  ;;  %v4316_v57 = vadd.f32 %v4306_v47, %v4158_v13  ;;  %v4320_v14 = vadd.f32 %v4306_v47, %v4168_v39 }
 0x1dc   :  { %v4324_v56 = vadd.f32 %v4306_v47, %v4170_v51  ;;  %v4331_v59 = vadd.f32 %v4306_v47, %v4196_v40  ;;  %v178_v13 = vmul.f32 0.0, %v3892_v38  ;;  %v4338_v39 = vadd.f32 %v4306_v47, %v4208_v23 }
 0x1dd   :  { %v916_v40 = vsub.f32 1.0, %v4289_v33  ;;  %v919_v38 = vsub.f32 1.0, %v4293_v25  ;;  %v959_v23 = vmul.f32 %v4308_v53, %v4050_v62  ;;  %v958_v2 = vmul.f32 %v4308_v53, %v4052_v19 }
 0x1de   :  { %v4327_v58 = vpop.permute.xlu1 %942  ;;  %v187_v44 = vpop.permute.xlu0 %186  ;;  %v909_v27 = vsub.f32 1.0, %v4312_v28  ;;  %vm1035_vm5 = vcmp.ge.f32.partialorder %v4312_v28, 0.0 }
 0x1df   :  { %v191_v5 = vadd.f32 %v187_v44, %v179_v37  ;;  %v908_v37 = vsub.f32 1.0, %v4316_v57  ;;  %v911_v44 = vsub.f32 1.0, %v4320_v14  ;;  %v951_v30 = vmul.f32 %v4327_v58, %v4050_v62 }
 0x1e0   :  { %v950_v0 = vmul.f32 %v4327_v58, %v4052_v19 }
 0x1e1   :  { %v201_v51 = vadd.f32 %v4200_v1, %v191_v5 }
 0x1e2   :  { %v185_v35 = vpop.permute.xlu1 %184  ;;  %v4334_v49 = vpop.permute.xlu0 %973 }
 0x1e3   :  { %v190_v17 = vadd.f32 %v185_v35, %v178_v13  ;;  %v985_v1 = vmul.f32 %v4334_v49, %v4066_v18  ;;  %v987_v61 = vmul.f32 %v4334_v49, %v4070_v8 }
 0x1e4   :  { %v3560_v24 = vpop.eup %3559 }
 0x1e5   :  { %v203_v34 = vmul.f32 %v3560_v24, %v201_v51  ;;  %v200_v5 = vadd.f32 %v4227_v52, %v190_v17  ;;  %v984_v52 = vmul.f32 %v4334_v49, %v4068_v10 }
 0x1e6   :  { %v4353_v45 = vpop.permute.xlu1 %968  ;;  %v4355_v50 = vpop.permute.xlu0 %889 }
 0x1e7   :  { %v205_v13 = vmax.f32 %v203_v34, 0.0  ;;  %v901_v35 = vadd.f32 %v4355_v50, %v4192_v55  ;;  %v900_v51 = vadd.f32 %v4355_v50, %v4194_v48  ;;  %v977_v43 = vmul.f32 %v4353_v45, %v4066_v18 }
 0x1e8   :  { %v3562_v24 = vpop.eup %3561  ;;  %v1001_v55 = vadd.f32 %v985_v1, %v959_v23  ;;  %v976_v62 = vmul.f32 %v4353_v45, %v4068_v10  ;;  %v913_v10 = vsub.f32 1.0, %v4331_v59 }
 0x1e9   :  { %v202_v17 = vmul.f32 %v3562_v24, %v200_v5  ;;  %v207_v34 = vmul.f32 0.5, %v205_v13  ;;  %v933_v16 = vsub.f32 %v917_v7, %v901_v35  ;;  %vm1059_vm6 = vcmp.ge.f32.partialorder %v901_v35, 0.0 }
 0x1ea   :  { %v4374_v32 = vpop.permute.xlu1 %884  ;;  %v4376_v48 = vpop.permute.xlu0 %1015  ;;  %v932_v26 = vsub.f32 %v916_v40, %v900_v51  ;;  %vm1058_vm7 = vcmp.ge.f32.partialorder %v900_v51, 0.0  ;;  %vm1075_vm8 = vmand %vm1043_vm3, %vm1059_vm6  ;;  %v993_v7 = vadd.f32 %v977_v43, %v951_v30  ;;  %v4395_v40 = vadd.f32 %v4355_v50, %v4202_v6 }
 0x1eb   :  { %v209_v18 = vadd.f32 0.5, %v207_v34  ;;  %v204_v42 = vmax.f32 %v202_v17, 0.0  ;;  %v893_v19 = vadd.f32 %v4374_v32, %v4219_v46  ;;  %v1027_v5 = vadd.f32 %v4376_v48, %v1001_v55  ;;  %vm4389_vm10 = vmand %vm1042_vm4, %vm1058_vm7 }
 0x1ec   :  { %vm1091_vm9 = vcmp.ge.f32.partialorder %v933_v16, 0.0  ;;  %v892_v23 = vadd.f32 %v4374_v32, %v4221_v4  ;;  %v992_v43 = vadd.f32 %v976_v62, %v950_v0  ;;  %v4408_v28 = vsub.f32 %v919_v38, %v4395_v40 }
 0x1ed   :  { %1417 = vperm.xlu0 %3529, %v209_v18   ;;  %v206_v46 = vmul.f32 0.5, %v204_v42  ;;  %v925_v1 = vsub.f32 %v909_v27, %v893_v19  ;;  %vm1051_vm11 = vcmp.ge.f32.partialorder %v893_v19, 0.0  ;;  %vm1107_vm12 = vmand %vm1075_vm8, %vm1091_vm9  ;;  %vm1123_vm13 = vcmp.gt.f32.partialorder %v1027_v5, 0.01 }
 0x1ee   :  { %v4397_v16 = vpop.permute.xlu1 %1010  ;;  %vm1067_vm14 = vmand %vm1035_vm5, %vm1051_vm11  ;;  %vm1155_vm15 = vcmp.lt.f32.partialorder %v1027_v5, 10.0  ;;  %v924_v4 = vsub.f32 %v908_v37, %v892_v23  ;;  %v1000_v42 = vadd.f32 %v984_v52, %v958_v2  ;;  %v895_v27 = vadd.f32 %v4374_v32, %v4223_v20  ;;  %v5240_v37 = vld [vmem:[#allocation21_spill] sm:$0xff] }
 0x1ef   :  { %v208_v33 = vadd.f32 0.5, %v206_v46  ;;  %v1019_v6 = vadd.f32 %v4397_v16, %v993_v7  ;;  %vm1083_vm0 = vcmp.ge.f32.partialorder %v925_v1, 0.0  ;;  %vm1139_vm1 = vmand %vm1107_vm12, %vm1123_vm13  ;;  %v1018_v30 = vadd.f32 %v4397_v16, %v992_v43 }
 0x1f0   :  { %vm1099_vm2 = vmand %vm1067_vm14, %vm1083_vm0  ;;  %v4412_v0 = vadd.f32 %v4355_v50, %v5240_v37  ;;  %v1026_v2 = vadd.f32 %v4376_v48, %v1000_v42  ;;  %vm1050_vm6 = vcmp.ge.f32.partialorder %v892_v23, 0.0  ;;  %vm1082_vm8 = vcmp.ge.f32.partialorder %v924_v4, 0.0 }
 0x1f1   :  { %1412 = vperm.xlu1 %3530, %v208_v33   ;;  %vm1115_vm3 = vcmp.gt.f32.partialorder %v1019_v6, 0.01  ;;  %vm1147_vm4 = vcmp.lt.f32.partialorder %v1019_v6, 10.0  ;;  %vm4415_vm5 = vmand %vm1139_vm1, %vm1155_vm15  ;;  %v927_v38 = vsub.f32 %v911_v44, %v895_v27  ;;  %v979_v35 = vmul.f32 %v4353_v45, %v4070_v8  ;;  %v5245_v8 = vld [vmem:[#allocation9_spill] sm:$0xff] }
 0x1f2   :  { %vm1131_vm7 = vmand %vm1099_vm2, %vm1115_vm3  ;;  %v4422_v20 = vsel %vm4415_vm5, %v1027_v5, -1.0  ;;  %vm1034_vm11 = vcmp.ge.f32.partialorder %v4316_v57, 0.0  ;;  %vm1090_vm12 = vcmp.ge.f32.partialorder %v932_v26, 0.0  ;;  %v4433_v24 = vadd.f32 %v4374_v32, %v4225_v54 }
 0x1f3   :  { %vm4426_vm9 = vmand %vm1131_vm7, %vm1147_vm4  ;;  %v910_v52 = vsub.f32 1.0, %v4324_v56  ;;  %vm1114_vm14 = vcmp.gt.f32.partialorder %v1018_v30, 0.01  ;;  %v953_v44 = vmul.f32 %v4327_v58, %v5245_v8  ;;  %v961_v34 = vmul.f32 %v4308_v53, %v5245_v8 }
 0x1f4   :  { %v4438_v17 = vsel %vm4426_vm9, %v1019_v6, -1.0  ;;  %vm1066_vm13 = vmand %vm1034_vm11, %vm1050_vm6  ;;  %vm1122_vm0 = vcmp.gt.f32.partialorder %v1026_v2, 0.01  ;;  %v5246_v57 = vsub.f32 1.0, %v4297_v31  ;;  %vm1146_vm2 = vcmp.lt.f32.partialorder %v1018_v30, 10.0 }
 0x1f5   :  { %v1201_v26 = vmax.f32 %v4438_v17, %v4422_v20  ;;  %vm1098_vm15 = vmand %vm1066_vm13, %vm1082_vm8  ;;  %v4447_v54 = vsub.f32 %v910_v52, %v4433_v24  ;;  %v995_v62 = vadd.f32 %v979_v35, %v953_v44  ;;  %v1003_v18 = vadd.f32 %v987_v61, %v961_v34 }
 0x1f6   :  { %v4452_v55 = vsub.f32 %v5246_v57, %v4412_v0  ;;  %vm1106_vm1 = vmand %vm4389_vm10, %vm1090_vm12  ;;  %vm1045_vm3 = vcmp.ge.f32.partialorder %v4293_v25, 0.0  ;;  %vm1154_vm6 = vcmp.lt.f32.partialorder %v1026_v2, 10.0  ;;  %vm1037_vm7 = vcmp.ge.f32.partialorder %v4320_v14, 0.0 }
 0x1f7   :  { %v1202_v19 = vrot.slane %v1201_v26, 4  ;;  %vm1130_vm4 = vmand %vm1098_vm15, %vm1114_vm14  ;;  %v921_v5 = vsub.f32 1.0, %v4301_v3  ;;  %v1021_v7 = vadd.f32 %v4397_v16, %v995_v62  ;;  %v1029_v23 = vadd.f32 %v4376_v48, %v1003_v18 }
 0x1f8   :  { %vm1138_vm8 = vmand %vm1106_vm1, %vm1122_vm0  ;;  %vm1053_vm11 = vcmp.ge.f32.partialorder %v895_v27, 0.0  ;;  %vm1061_vm12 = vcmp.ge.f32.partialorder %v4395_v40, 0.0  ;;  %v4470_v4 = vadd.f32 %v4374_v32, %v4229_v22  ;;  %v4474_v43 = vadd.f32 %v4355_v50, %v4215_v41 }
 0x1f9   :  { %v1203_v46 = vmax.f32 %v1201_v26, %v1202_v19  ;;  %vm4463_vm10 = vmand %vm1130_vm4, %vm1146_vm2  ;;  %vm1085_vm14 = vcmp.ge.f32.partialorder %v927_v38, 0.0  ;;  %vm1093_vm15 = vcmp.ge.f32.partialorder %v4408_v28, 0.0  ;;  %v4487_v40 = vadd.f32 %v4374_v32, %v4243_v9  ;;  %v5251_v9 = vld [vmem:[#allocation14_spill] sm:$0xff] }
 0x1fa   :  { %vm4476_vm13 = vmand %vm1138_vm8, %vm1154_vm6  ;;  %v4482_v33 = vsel %vm4463_vm10, %v1018_v30, -1.0  ;;  %v4496_v6 = vsub.f32 %v913_v10, %v4470_v4  ;;  %v4499_v42 = vsub.f32 %v921_v5, %v4474_v43  ;;  %vm1117_vm2 = vcmp.gt.f32.partialorder %v1021_v7, 0.01 }
 0x1fb   :  { %v1204_v22 = vrot.slane %v1203_v46, 2  ;;  %v4491_v41 = vsel %vm4476_vm13, %v1026_v2, -1.0  ;;  %vm1069_vm0 = vmand %vm1037_vm7, %vm1053_vm11  ;;  %v978_v27 = vmul.f32 %v4353_v45, %v5251_v9  ;;  %v986_v14 = vmul.f32 %v4334_v49, %v5251_v9  ;;  %v5252_v2 = vld [vmem:[#allocation10_spill] sm:$0xff] }
 0x1fc   :  { %v1194_v30 = vmax.f32 %v4482_v33, %v4491_v41  ;;  %vm1077_vm1 = vmand %vm1045_vm3, %vm1061_vm12  ;;  %vm1125_vm6 = vcmp.gt.f32.partialorder %v1029_v23, 0.01  ;;  %v960_v38 = vmul.f32 %v4308_v53, %v5252_v2  ;;  %v912_v35 = vsub.f32 1.0, %v4338_v39 }
 0x1fd   :  { %v1205_v37 = vmax.f32 %v1203_v46, %v1204_v22  ;;  %vm1101_vm4 = vmand %vm1069_vm0, %vm1085_vm14  ;;  %vm1149_vm3 = vcmp.lt.f32.partialorder %v1021_v7, 10.0  ;;  %v952_v25 = vmul.f32 %v4327_v58, %v5252_v2  ;;  %v920_v8 = vsub.f32 1.0, %v4304_v60 }
 0x1fe   :  { %v1195_v52 = vrot.slane %v1194_v30, 4  ;;  %vm1109_vm7 = vmand %vm1077_vm1, %vm1093_vm15  ;;  %vm1157_vm11 = vcmp.lt.f32.partialorder %v1029_v23, 10.0  ;;  %v4519_v34 = vadd.f32 %v4355_v50, %v4245_v63  ;;  %v4522_v26 = vsub.f32 %v912_v35, %v4487_v40 }
 0x1ff   :  { %v1206_v44 = vrot.slane %v1205_v37, 1  ;;  %vm1133_vm8 = vmand %vm1101_vm4, %vm1117_vm2  ;;  %v994_v28 = vadd.f32 %v978_v27, %v952_v25  ;;  %v1002_v62 = vadd.f32 %v986_v14, %v960_v38  ;;  %vm1052_vm14 = vcmp.ge.f32.partialorder %v4433_v24, 0.0 }
 0x200   :  { %v1196_v57 = vmax.f32 %v1194_v30, %v1195_v52  ;;  %vm1141_vm12 = vmand %vm1109_vm7, %vm1125_vm6  ;;  %vm1036_vm0 = vcmp.ge.f32.partialorder %v4324_v56, 0.0  ;;  %v4531_v5 = vsub.f32 %v920_v8, %v4519_v34  ;;  %vm1060_vm6 = vcmp.ge.f32.partialorder %v4412_v0, 0.0 }
 0x201   :  { %v1207_v18 = vmax.f32 %v1205_v37, %v1206_v44  ;;  %vm4525_vm15 = vmand %vm1133_vm8, %vm1149_vm3  ;;  %v1020_v24 = vadd.f32 %v4397_v16, %v994_v28  ;;  %v1028_v22 = vadd.f32 %v4376_v48, %v1002_v62  ;;  %vm1084_vm8 = vcmp.ge.f32.partialorder %v4447_v54, 0.0 }
 0x202   :  { %v1197_v63 = vrot.slane %v1196_v57, 2  ;;  %vm4533_vm1 = vmand %vm1141_vm12, %vm1157_vm11  ;;  %v4539_v46 = vsel %vm4525_vm15, %v1021_v7, -1.0  ;;  %v5257_v7 = vmov 0  ;;  %vm1044_vm12 = vcmp.ge.f32.partialorder %v4297_v31, 0.0 }
 0x203   :  { %vm1259_vm2 = vcmp.eq.f32.partialorder %v4422_v20, %v1207_v18  ;;  %vm1251_vm4 = vcmp.eq.f32.partialorder %v4438_v17, %v1207_v18  ;;  %v4547_v56 = vsel %vm4533_vm1, %v1029_v23, -1.0  ;;  %vm1068_vm7 = vmand %vm1036_vm0, %vm1052_vm14  ;;  %v5259_v20 = vmov 0  ;;  %v5261_v17 = vld [vmem:[#allocation11_spill] sm:$0xff]  ;;  %v5274_v18 = vld [vmem:[#allocation18_spill] sm:$0xff] }
 0x204   :  { %vm4552_vm3 = vmand %vm1259_vm2, %vm4415_vm5  ;;  %v1198_v30 = vmax.f32 %v1196_v57, %v1197_v63  ;;  %v1215_v9 = vmax.f32 %v4539_v46, %v4547_v56  ;;  %vm1092_vm14 = vcmp.ge.f32.partialorder %v4452_v55, 0.0  ;;  %vm1116_vm0 = vcmp.gt.f32.partialorder %v1020_v24, 0.01  ;;  %v5275_v63 = vld [vmem:[#allocation20_spill] sm:$0xff] }
 0x205   :  { %v5258_v7 = vsel %vm4552_vm3, 4294967295, %v5257_v7  ;;  %vm4561_vm11 = vmand %vm1251_vm4, %vm4426_vm9  ;;  %vm1124_vm3 = vcmp.gt.f32.partialorder %v1028_v22, 0.01  ;;  %v955_v23 = vmul.f32 %v4327_v58, %v5261_v17  ;;  %v989_v51 = vmul.f32 %v4334_v49, %v4074_v29 }
 0x206   :  { %v5260_v20 = vsel %vm4561_vm11, 4294967295, %v5259_v20  ;;  %v1199_v0 = vrot.slane %v1198_v30, 1  ;;  %v1216_v13 = vrot.slane %v1215_v9, 4  ;;  %vm1076_vm5 = vmand %vm1044_vm12, %vm1060_vm6  ;;  %v963_v31 = vmul.f32 %v4308_v53, %v5261_v17 }
 0x207   :  { %vm1100_vm2 = vmand %vm1068_vm7, %vm1084_vm8  ;;  %v981_v55 = vmul.f32 %v4353_v45, %v4074_v29  ;;  %v4581_v37 = vadd.f32 %v4306_v47, %v4252_v11  ;;  %v4585_v2 = vadd.f32 %v4279_v12, %v4254_v36  ;;  %v4589_v38 = vadd.f32 %v4374_v32, %v4267_v15 }
 0x208   :  { %v1200_v54 = vmax.f32 %v1198_v30, %v1199_v0  ;;  %v1217_v27 = vmax.f32 %v1215_v9, %v1216_v13  ;;  %vm1108_vm9 = vmand %vm1076_vm5, %vm1092_vm14  ;;  %v4593_v35 = vadd.f32 %v4355_v50, %v4269_v21  ;;  %vm1148_vm12 = vcmp.lt.f32.partialorder %v1020_v24, 10.0  ;;  %v5278_v13 = vld [vmem:[#allocation19_spill] sm:$0xff] }
 0x209   :  { %vm4575_vm4 = vmand %vm1100_vm2, %vm1116_vm0  ;;  %v5266_v36 = vmov 0  ;;  %vm1156_vm5 = vcmp.lt.f32.partialorder %v1028_v22, 10.0  ;;  %v1005_v15 = vadd.f32 %v989_v51, %v963_v31  ;;  %v915_v21 = vsub.f32 1.0, %v4581_v37 }
 0x20a   :  { %vm1258_vm6 = vcmp.eq.f32.partialorder %v4491_v41, %v1200_v54  ;;  %vm1250_vm7 = vcmp.eq.f32.partialorder %v4482_v33, %v1200_v54  ;;  %v1218_v29 = vrot.slane %v1217_v27, 2  ;;  %vm4598_vm8 = vmand %vm1108_vm9, %vm1124_vm3  ;;  %v923_v41 = vsub.f32 1.0, %v4585_v2 }
 0x20b   :  { %vm4604_vm14 = vmand %vm1258_vm6, %vm4476_vm13  ;;  %v5268_v33 = vmov 0  ;;  %v997_v25 = vadd.f32 %v981_v55, %v955_v23  ;;  %vm1039_vm3 = vcmp.ge.f32.partialorder %v4331_v59, 0.0  ;;  %vm1055_vm13 = vcmp.ge.f32.partialorder %v4470_v4, 0.0  ;;  %v5281_v23 = vld [vmem:[#allocation12_spill] sm:$0xff] }
 0x20c   :  { %v5267_v36 = vsel %vm4604_vm14, 4294967295, %v5266_v36  ;;  %vm4612_vm0 = vmand %vm1250_vm7, %vm4463_vm10  ;;  %v1219_v52 = vmax.f32 %v1217_v27, %v1218_v29  ;;  %v1031_v8 = vadd.f32 %v4376_v48, %v1005_v15  ;;  %vm1063_vm9 = vcmp.ge.f32.partialorder %v4474_v43, 0.0 }
 0x20d   :  { %v5269_v33 = vsel %vm4612_vm0, 4294967295, %v5268_v33  ;;  %vm4620_vm2 = vmand %vm4575_vm4, %vm1148_vm12  ;;  %v4627_v1 = vsub.f32 %v915_v21, %v4589_v38  ;;  %v4630_v44 = vsub.f32 %v923_v41, %v4593_v35  ;;  %v1023_v28 = vadd.f32 %v4397_v16, %v997_v25  ;;  %v5290_v21 = vld [vmem:[#allocation24_spill] sm:$0xff] }
 0x20e   :  { %v1220_v57 = vrot.slane %v1219_v52, 1  ;;  %vm4635_vm10 = vmand %vm4598_vm8, %vm1156_vm5  ;;  %v4641_v4 = vsel %vm4620_vm2, %v1020_v24, -1.0  ;;  %vm1087_vm4 = vcmp.ge.f32.partialorder %v4496_v6, 0.0  ;;  %vm1047_vm6 = vcmp.ge.f32.partialorder %v4301_v3, 0.0  ;;  %v5276_v6 = vld [vmem:[#allocation15_spill] sm:$0xff] }
 0x20f   :  { %v4647_v62 = vsel %vm4635_vm10, %v1028_v22, -1.0  ;;  %vm1071_vm7 = vmand %vm1039_vm3, %vm1055_vm13  ;;  %vm1095_vm8 = vcmp.ge.f32.partialorder %v4499_v42, 0.0  ;;  %v864_v30 = vmul.f32 %v5275_v63, %v5274_v18  ;;  %v980_v0 = vmul.f32 %v4353_v45, %v5276_v6  ;;  %v5277_v22 = vld [vmem:[#allocation17_spill] sm:$0xff] }
 0x210   :  { %v1221_v9 = vmax.f32 %v1219_v52, %v1220_v57  ;;  %v1208_v24 = vmax.f32 %v4641_v4, %v4647_v62  ;;  %vm1079_vm12 = vmand %vm1047_vm6, %vm1063_vm9  ;;  %v838_v17 = vmul.f32 %v5278_v13, %v5277_v22  ;;  %vm1127_vm3 = vcmp.gt.f32.partialorder %v1031_v8, 0.01 }
 0x211   :  { %vm4661_vm5 = vmand %vm1071_vm7, %vm1087_vm4  ;;  %vm1159_vm13 = vcmp.lt.f32.partialorder %v1031_v8, 10.0  ;;  %v954_v51 = vmul.f32 %v4327_v58, %v5281_v23  ;;  %v988_v54 = vmul.f32 %v4334_v49, %v5276_v6  ;;  %vm1119_vm4 = vcmp.gt.f32.partialorder %v1023_v28, 0.01 }
 0x212   :  { %vm1261_vm9 = vcmp.eq.f32.partialorder %v4547_v56, %v1221_v9  ;;  %v1209_v43 = vrot.slane %v1208_v24, 4  ;;  %vm1253_vm6 = vcmp.eq.f32.partialorder %v4539_v46, %v1221_v9  ;;  %vm4673_vm0 = vmand %vm1079_vm12, %vm1095_vm8  ;;  %v5284_v31 = vmov 0  ;;  %v5286_v56 = vld [vmem:[#allocation22_spill] sm:$0xff]  ;;  %v5287_v46 = vld [vmem:[#allocation23_spill] sm:$0xff] }
 0x213   :  { %vm4679_vm7 = vmand %vm1261_vm9, %vm4533_vm1  ;;  %v962_v55 = vmul.f32 %v4308_v53, %v5281_v23  ;;  %v4687_v14 = vadd.f32 %v4306_v47, %v5286_v56  ;;  %v4691_v42 = vadd.f32 %v4279_v12, %v5287_v46  ;;  %v880_v29 = vadd.f32 %v864_v30, %v838_v17 }
 0x214   :  { %v5285_v31 = vsel %vm4679_vm7, 4294967295, %v5284_v31  ;;  %v1210_v11 = vmax.f32 %v1208_v24, %v1209_v43  ;;  %vm4695_vm8 = vmand %vm1253_vm6, %vm4525_vm15  ;;  %v5288_v10 = vmov 0  ;;  %vm1151_vm1 = vcmp.lt.f32.partialorder %v1023_v28, 10.0 }
 0x215   :  { %v5289_v10 = vsel %vm4695_vm8, 4294967295, %v5288_v10  ;;  %v996_v15 = vadd.f32 %v980_v0, %v954_v51  ;;  %v4701_v41 = vadd.f32 %v4374_v32, %v5290_v21  ;;  %vm1135_vm12 = vmand %vm4661_vm5, %vm1119_vm4  ;;  %v1004_v47 = vadd.f32 %v988_v54, %v962_v55 }
 0x216   :  { %v4706_v12 = vadd.f32 %v4355_v50, %v880_v29  ;;  %v914_v52 = vsub.f32 1.0, %v4687_v14  ;;  %v922_v19 = vsub.f32 1.0, %v4691_v42  ;;  %v1211_v25 = vrot.slane %v1210_v11, 2  ;;  %vm1143_vm15 = vmand %vm4673_vm0, %vm1127_vm3 }
 0x217   :  { %v1022_v57 = vadd.f32 %v4397_v16, %v996_v15  ;;  %vm1054_vm9 = vcmp.ge.f32.partialorder %v4487_v40, 0.0  ;;  %vm4715_vm6 = vmand %vm1135_vm12, %vm1151_vm1  ;;  %v1030_v50 = vadd.f32 %v4376_v48, %v1004_v47  ;;  %vm1062_vm5 = vcmp.ge.f32.partialorder %v4519_v34, 0.0 }
 0x218   :  { %v4722_v63 = vsub.f32 %v914_v52, %v4701_v41  ;;  %v4725_v30 = vsub.f32 %v922_v19, %v4706_v12  ;;  %v1212_v9 = vmax.f32 %v1210_v11, %v1211_v25  ;;  %vm4728_vm0 = vmand %vm1143_vm15, %vm1159_vm13  ;;  %v4734_v40 = vsel %vm4715_vm6, %v1023_v28, -1.0  ;;  %v5295_v28 = vld [vmem:[#allocation16_spill] sm:$0xff] }
 0x219   :  { %vm1038_vm3 = vcmp.ge.f32.partialorder %v4338_v39, 0.0  ;;  %vm1086_vm4 = vcmp.ge.f32.partialorder %v4522_v26, 0.0  ;;  %v4740_v34 = vsel %vm4728_vm0, %v1031_v8, -1.0  ;;  %vm1046_vm1 = vcmp.ge.f32.partialorder %v4304_v60, 0.0  ;;  %v5296_v60 = vld [vmem:[#allocation13_spill] sm:$0xff] }
 0x21a   :  { %vm1070_vm12 = vmand %vm1038_vm3, %vm1054_vm9  ;;  %vm1094_vm13 = vcmp.ge.f32.partialorder %v4531_v5, 0.0  ;;  %v1213_v6 = vrot.slane %v1212_v9, 1  ;;  %v1229_v0 = vmax.f32 %v4734_v40, %v4740_v34  ;;  %vm1118_vm8 = vcmp.gt.f32.partialorder %v1022_v57, 0.01 }
 0x21b   :  { %vm1078_vm15 = vmand %vm1046_vm1, %vm1062_vm5  ;;  %v983_v39 = vmul.f32 %v4353_v45, %v5295_v28  ;;  %vm1126_vm11 = vcmp.gt.f32.partialorder %v1030_v50, 0.01  ;;  %v991_v26 = vmul.f32 %v4334_v49, %v5295_v28  ;;  %v957_v5 = vmul.f32 %v4327_v58, %v5296_v60 }
 0x21c   :  { %vm1102_vm7 = vmand %vm1070_vm12, %vm1086_vm4  ;;  %v1214_v8 = vmax.f32 %v1212_v9, %v1213_v6  ;;  %v1230_v13 = vrot.slane %v1229_v0, 4  ;;  %vm1150_vm5 = vcmp.lt.f32.partialorder %v1022_v57, 10.0  ;;  %v965_v3 = vmul.f32 %v4308_v53, %v5296_v60 }
 0x21d   :  { %vm1110_vm14 = vmand %vm1078_vm15, %vm1094_vm13  ;;  %v999_v51 = vadd.f32 %v983_v39, %v957_v5  ;;  %v5299_v54 = vmov 0  ;;  %v5301_v27 = vmov 0  ;;  %v5303_v59 = vmov 0 }
 0x21e   :  { %vm4752_vm9 = vmand %vm1102_vm7, %vm1118_vm8  ;;  %vm1260_vm3 = vcmp.eq.f32.partialorder %v4647_v62, %v1214_v8  ;;  %vm1252_vm4 = vcmp.eq.f32.partialorder %v4641_v4, %v1214_v8  ;;  %v1231_v23 = vmax.f32 %v1229_v0, %v1230_v13  ;;  %vm1158_vm7 = vcmp.lt.f32.partialorder %v1030_v50, 10.0 }
 0x21f   :  { %vm1142_vm1 = vmand %vm1110_vm14, %vm1126_vm11  ;;  %v1007_v43 = vadd.f32 %v991_v26, %v965_v3  ;;  %v1025_v4 = vadd.f32 %v4397_v16, %v999_v51  ;;  %vm1057_vm11 = vcmp.ge.f32.partialorder %v4589_v38, 0.0  ;;  %v5305_v56 = vmov 0 }
 0x220   :  { %vm4762_vm12 = vmand %vm1260_vm3, %vm4635_vm10  ;;  %v1232_v62 = vrot.slane %v1231_v23, 2  ;;  %vm1065_vm10 = vcmp.ge.f32.partialorder %v4593_v35, 0.0  ;;  %vm1041_vm13 = vcmp.ge.f32.partialorder %v4581_v37, 0.0  ;;  %vm1089_vm15 = vcmp.ge.f32.partialorder %v4627_v1, 0.0  ;;  %v63_v51 = vpop.xlane.xlu1 %62 }
 0x221   :  { %v5300_v54 = vsel %vm4762_vm12, 4294967295, %v5299_v54  ;;  %vm4768_vm8 = vmand %vm1252_vm4, %vm4620_vm2  ;;  %v1033_v55 = vadd.f32 %v4376_v48, %v1007_v43  ;;  %vm1097_vm3 = vcmp.ge.f32.partialorder %v4630_v44, 0.0  ;;  %v982_v11 = vmul.f32 %v4353_v45, %v5274_v18 }
 0x222   :  { %v5302_v27 = vsel %vm4768_vm8, 4294967295, %v5301_v27  ;;  %vm4776_vm14 = vmand %vm4752_vm9, %vm1150_vm5  ;;  %v1233_v61 = vmax.f32 %v1231_v23, %v1232_v62  ;;  %vm1049_vm9 = vcmp.ge.f32.partialorder %v4585_v2, 0.0  ;;  %v990_v37 = vmul.f32 %v4334_v49, %v5274_v18  ;;  %v66_v23 = vpop.xlane.xlu0 %65 }
 0x223   :  { %v5304_v59 = vsel %vm4776_vm14, 4294967295, %v5303_v59  ;;  %vm4782_vm2 = vmand %vm1142_vm1, %vm1158_vm7  ;;  %v4788_v46 = vsel %vm4776_vm14, %v1022_v57, -1.0  ;;  %vm1121_vm1 = vcmp.gt.f32.partialorder %v1025_v4, 0.01  ;;  %vm1129_vm8 = vcmp.gt.f32.partialorder %v1033_v55, 0.01 }
 0x224   :  { %v5306_v56 = vsel %vm4782_vm2, 4294967295, %v5305_v56  ;;  %v1190_v38 = vsel %vm4782_vm2, %v1030_v50, -1.0  ;;  %vm1073_vm5 = vmand %vm1041_vm13, %vm1057_vm11  ;;  %v1234_v35 = vrot.slane %v1233_v61, 1  ;;  %v956_v2 = vmul.f32 %v4327_v58, %v5277_v22 }
 0x225   :  { %v1222_v29 = vmax.f32 %v4788_v46, %v1190_v38  ;;  %vm1081_vm4 = vmand %vm1049_vm9, %vm1065_vm10  ;;  %vm1153_vm10 = vcmp.lt.f32.partialorder %v1025_v4, 10.0  ;;  %v964_v21 = vmul.f32 %v4308_v53, %v5277_v22  ;;  %v5309_v18 = vmov 0 }
 0x226   :  { %vm1105_vm7 = vmand %vm1073_vm5, %vm1089_vm15  ;;  %v1235_v1 = vmax.f32 %v1233_v61, %v1234_v35  ;;  %v998_v49 = vadd.f32 %v982_v11, %v956_v2  ;;  %v5311_v53 = vmov 0  ;;  %v5313_v52 = vmov 0  ;;  %v72_v61 = vpop.xlane.xlu1 %71 }
 0x227   :  { %v1223_v15 = vrot.slane %v1222_v29, 4  ;;  %vm1113_vm12 = vmand %vm1081_vm4, %vm1097_vm3  ;;  %vm1161_vm3 = vcmp.lt.f32.partialorder %v1033_v55, 10.0  ;;  %v1006_v58 = vadd.f32 %v990_v37, %v964_v21  ;;  %v5315_v57 = vmov 0 }
 0x228   :  { %vm4803_vm11 = vmand %vm1105_vm7, %vm1121_vm1  ;;  %vm1263_vm13 = vcmp.eq.f32.partialorder %v4740_v34, %v1235_v1  ;;  %vm1255_vm15 = vcmp.eq.f32.partialorder %v4734_v40, %v1235_v1  ;;  %v1024_v22 = vadd.f32 %v4397_v16, %v998_v49  ;;  %vm1088_vm7 = vcmp.ge.f32.partialorder %v4722_v63, 0.0 }
 0x229   :  { %v1224_v45 = vmax.f32 %v1222_v29, %v1223_v15  ;;  %vm1145_vm9 = vmand %vm1113_vm12, %vm1129_vm8  ;;  %vm1056_vm12 = vcmp.ge.f32.partialorder %v4701_v41, 0.0  ;;  %v1032_v19 = vadd.f32 %v4376_v48, %v1006_v58  ;;  %v81_v2 = vmul.f32 0.015625, %v66_v23 }
 0x22a   :  { %vm4813_vm5 = vmand %vm1263_vm13, %vm4728_vm0  ;;  %vm1064_vm0 = vcmp.ge.f32.partialorder %v4706_v12, 0.0  ;;  %vm1096_vm13 = vcmp.ge.f32.partialorder %v4725_v30, 0.0  ;;  %v80_v44 = vmul.f32 0.015625, %v63_v51  ;;  %v78_v58 = vpop.xlane.xlu1 %77 }
 0x22b   :  { %v5310_v18 = vsel %vm4813_vm5, 4294967295, %v5309_v18  ;;  %v1225_v47 = vrot.slane %v1224_v45, 2  ;;  %vm4819_vm4 = vmand %vm1255_vm15, %vm4715_vm6  ;;  %vm1040_vm6 = vcmp.ge.f32.partialorder %v4687_v14, 0.0 }
 0x22c   :  { %v5312_v53 = vsel %vm4819_vm4, 4294967295, %v5311_v53  ;;  %vm4827_vm8 = vmand %vm4803_vm11, %vm1153_vm10  ;;  %vm1048_vm11 = vcmp.ge.f32.partialorder %v4691_v42, 0.0  ;;  %vm1128_vm4 = vcmp.gt.f32.partialorder %v1032_v19, 0.01  ;;  %v5318_v42 = vmov 0.0  }
 0x22d   :  { %v5314_v52 = vsel %vm4827_vm8, 4294967295, %v5313_v52  ;;  %v1226_v25 = vmax.f32 %v1224_v45, %v1225_v47  ;;  %vm4833_vm1 = vmand %vm1145_vm9, %vm1161_vm3  ;;  %v1185_v16 = vsel %vm4827_vm8, %v1025_v4, -1.0  ;;  %vm1120_vm9 = vcmp.gt.f32.partialorder %v1024_v22, 0.01 }
 0x22e   :  { %v5316_v57 = vsel %vm4833_vm1, 4294967295, %v5315_v57  ;;  %v1193_v41 = vsel %vm4833_vm1, %v1033_v55, -1.0  ;;  %vm1072_vm10 = vmand %vm1040_vm6, %vm1056_vm12  ;;  %vm1152_vm6 = vcmp.lt.f32.partialorder %v1024_v22, 10.0  ;;  %vm5317_vm12 = vnez %v5306_v56  ;;  %v69_v55 = vpop.xlane.xlu0 %68 }
 0x22f   :  { %v1227_v48 = vrot.slane %v1226_v25, 1  ;;  %v1243_v12 = vmax.f32 %v1185_v16, %v1193_v41  ;;  %vm1080_vm15 = vmand %vm1048_vm11, %vm1064_vm0  ;;  %vm1160_vm11 = vcmp.lt.f32.partialorder %v1032_v19, 10.0  ;;  %v5326_v56 = vlaneseq }
 0x230   :  { %vm1104_vm3 = vmand %vm1072_vm10, %vm1088_vm7  ;;  %vm5319_vm7 = vnez %v5304_v59  ;;  %v82_v21 = vmul.f32 0.015625, %v69_v55  ;;  %v83_v45 = vmul.f32 0.015625, %v72_v61 }
 0x231   :  { %v1228_v32 = vmax.f32 %v1226_v25, %v1227_v48  ;;  %v1244_v50 = vrot.slane %v1243_v12, 4  ;;  %vm1112_vm5 = vmand %vm1080_vm15, %vm1096_vm13 }
 0x232   :  { %vm1136_vm8 = vmand %vm1104_vm3, %vm1120_vm9  ;;  %v75_v49 = vpop.xlane.xlu0 %74 }
 0x233   :  { %vm1262_vm14 = vcmp.eq.f32.partialorder %v1190_v38, %v1228_v32  ;;  %vm1254_vm2 = vcmp.eq.f32.partialorder %v4788_v46, %v1228_v32  ;;  %v1245_v14 = vmax.f32 %v1243_v12, %v1244_v50  ;;  %vm1144_vm1 = vmand %vm1112_vm5, %vm1128_vm4  ;;  %vm5324_vm4 = vnez %v5316_v57  ;;  %v5327_v38 = vld [vmem:[#allocation8_spill] sm:$0xff] }
 0x234   :  { %vm1278_vm0 = vmand %vm1262_vm14, %vm5317_vm12  ;;  %v1443_v46 = vshrl.u32 %v5326_v56, 7  ;;  %v1446_v35 = vadd.s32 4294967288, %v5327_v38  ;;  %v84_v47 = vmul.f32 0.015625, %v75_v49 }
 0x235   :  { %v4849_v63 = vsel %vm1278_vm0, 1.0, %v5318_v42  ;;  %vm1270_vm10 = vmand %vm1254_vm2, %vm5319_vm7  ;;  %v1246_v30 = vrot.slane %v1245_v14, 2  ;;  %vm1451_vm0 = vcmask 130112   ;;  %vm1473_vm7 = vcmask 1042434  }
 0x236   :  { %v4854_v9 = vsel %vm1270_vm10, 1.0, %v5318_v42  ;;  %vm4856_vm13 = vmand %vm1136_vm8, %vm1152_vm6  ;;  %v1449_v1 = vsub.s32 %v1446_v35, %v1443_v46  ;;  %v1444_v15 = vsub.s32 %v5327_v38, %v1443_v46  ;;  %vm1475_vm10 = vcmask 130048  }
 0x237   :  { %v4862_v40 = vadd.f32 %v4849_v63, %v4854_v9  ;;  %v1247_v34 = vmax.f32 %v1245_v14, %v1246_v30  ;;  %vm4864_vm14 = vmand %vm1144_vm1, %vm1160_vm11  ;;  %v1184_v0 = vsel %vm4856_vm13, %v1024_v22, -1.0  ;;  %vm5325_vm1 = vnez %v5314_v52 }
 0x238   :  { %v1192_v28 = vsel %vm4864_vm14, %v1032_v19, -1.0  ;;  %v85_v22 = vmul.f32 0.015625, %v78_v58  ;;  %v1450_v52 = vrot.slane %v81_v2, %v1449_v1  ;;  %v1445_v19 = vrot.slane %v80_v44, %v1444_v15 }
 0x239   :  { %v1248_v39 = vrot.slane %v1247_v34, 1  ;;  %v1236_v26 = vmax.f32 %v1184_v0, %v1192_v28  ;;  %v1456_v25 = vrot.slane %v82_v21, %v1444_v15  ;;  %v1460_v57 = vrot.slane %v83_v45, %v1449_v1 }
 0x23a   :  { %v1452_v48 = vsel %vm1451_vm0, %v1450_v52, %v1445_v19  ;;  %vm1471_vm11 = vcmask 1041409  }
 0x23b   :  { %v1249_v8 = vmax.f32 %v1247_v34, %v1248_v39  ;;  %v1237_v13 = vrot.slane %v1236_v26, 4  ;;  %v1461_v12 = vsel %vm1451_vm0, %v1460_v57, %v1456_v25 }
 0x23c   :  { %v1472_v32 = vsel %vm1471_vm11, %v1461_v12, %v1452_v48 }
 0x23d   :  { %vm1265_vm2 = vcmp.eq.f32.partialorder %v1193_v41, %v1249_v8  ;;  %v1238_v60 = vmax.f32 %v1236_v26, %v1237_v13  ;;  %vm1257_vm5 = vcmp.eq.f32.partialorder %v1185_v16, %v1249_v8  ;;  %v1465_v16 = vrot.slane %v84_v47, %v1444_v15 }
 0x23e   :  { %vm1281_vm8 = vmand %vm1265_vm2, %vm5324_vm4  ;;  %v1469_v41 = vrot.slane %v85_v22, %v1449_v1  ;;  %vm5330_vm2 = vnez %v5260_v20  ;;  %vm5332_vm4 = vnez %v5285_v31 }
 0x23f   :  { %v4875_v5 = vsel %vm1281_vm8, 1.0, %v5318_v42  ;;  %v1239_v17 = vrot.slane %v1238_v60, 2  ;;  %vm1273_vm15 = vmand %vm1257_vm5, %vm5325_vm1  ;;  %vm5331_vm5 = vnez %v5269_v33  ;;  %v4956_v33 = vsel %vm5332_vm4, 1.0, %v5318_v42 }
 0x240   :  { %v4880_v3 = vsel %vm1273_vm15, 1.0, %v5318_v42  ;;  %v1470_v50 = vsel %vm1451_vm0, %v1469_v41, %v1465_v16  ;;  %vm5333_vm8 = vnez %v5300_v54  ;;  %vm5334_vm1 = vnez %v5289_v10 }
 0x241   :  { %v1240_v43 = vmax.f32 %v1238_v60, %v1239_v17  ;;  %v4884_v62 = vadd.f32 %v4875_v5, %v4880_v3  ;;  %v1474_v14 = vsel %vm1473_vm7, %v1470_v50, %v1472_v32  ;;  %v4941_v17 = vsel %vm5331_vm5, 1.0, %v5318_v42 }
 0x242   :  { %v1476_v30 = vsel %vm1475_vm10, %v1474_v14, 0  ;;  %v4969_v35 = vsel %vm5333_vm8, 1.0, %v5318_v42  ;;  %v4980_v21 = vsel %vm5334_vm1, 1.0, %v5318_v42  ;;  %vm5335_vm15 = vnez %v5302_v27 }
 0x243   :  { %v1241_v4 = vrot.slane %v1240_v43, 1  ;;  %v4903_v24 = vand.u32 4294901760, %v1476_v30  ;;  %v4989_v22 = vsel %vm5335_vm15, 1.0, %v5318_v42 }
 0x245   :  { %v1242_v59 = vmax.f32 %v1240_v43, %v1241_v4  ;;  %v4906_v34 = vsub.f32 %v1476_v30, %v4903_v24 }
 0x247   :  { %vm1264_vm9 = vcmp.eq.f32.partialorder %v1192_v28, %v1242_v59  ;;  %vm1256_vm3 = vcmp.eq.f32.partialorder %v1184_v0, %v1242_v59  ;;  %v4921_v39 = vand.u32 4294901760, %v4906_v34 }
 0x248   :  { %vm1280_vm6 = vmand %vm1264_vm9, %vm4864_vm14  ;;  %vm5329_vm14 = vnez %v5267_v36  ;;  %v4936_v36 = vsel %vm5330_vm2, 1.0, %v5318_v42  ;;  %vm5336_vm9 = vnez %v5310_v18 }
 0x249   :  { %v4891_v29 = vsel %vm1280_vm6, 1.0, %v5318_v42  ;;  %vm1272_vm12 = vmand %vm1256_vm3, %vm4856_vm13  ;;  %vm5328_vm13 = vnez %v5258_v7  ;;  %v4918_v28 = vsel %vm5329_vm14, 1.0, %v5318_v42  ;;  %v1550_v23 = vsub.f32 %v4906_v34, %v4921_v39 }
 0x24a   :  { %v4896_v11 = vsel %vm1272_vm12, 1.0, %v5318_v42  ;;  %v4913_v0 = vsel %vm5328_vm13, 1.0, %v5318_v42  ;;  %vm5337_vm3 = vnez %v5312_v53 }
 0x24b   :  { %v4900_v37 = vadd.f32 %v4891_v29, %v4896_v11  ;;  %v4962_v46 = vand.u32 4294901760, %v1550_v23 }
 0x268   :  { %v4908_v6 = vpop.permute.xlu0 %1417 }
 0x269   :  { %v1429_v26 = vmul.f32 %v4913_v0, %v4908_v6  ;;  %v1428_v8 = vmul.f32 %v4918_v28, %v4908_v6  ;;  %v1431_v38 = vmul.f32 %v4956_v33, %v4908_v6  ;;  %v1430_v44 = vmul.f32 %v4969_v35, %v4908_v6 }
 0x26a   :  { %v1432_v18 = vmul.f32 %v4849_v63, %v4908_v6 }
 0x26b   :  { %v4927_v13 = vand.u32 4294901760, %v1429_v26  ;;  %v4929_v60 = vand.u32 4294901760, %v1428_v8  ;;  %v4991_v19 = vand.u32 4294901760, %v1431_v38  ;;  %v4996_v41 = vand.u32 4294901760, %v1430_v44 }
 0x26c   :  { %v4931_v7 = vpop.permute.xlu1 %1412 }
 0x26d   :  { %1507 = vmatprep.subr.mxu0 %v4927_v13  ;;  %v1421_v51 = vmul.f32 %v4936_v36, %v4931_v7  ;;  %v1420_v43 = vmul.f32 %v4941_v17, %v4931_v7  ;;  %v1587_v20 = vsub.f32 %v1429_v26, %v4927_v13  ;;  %v1593_v4 = vsub.f32 %v1428_v8, %v4929_v60 }
 0x26e   :  { %1509 = vmatpush1.msra.mxu0 %v4929_v60  ;;  %v1423_v47 = vmul.f32 %v4980_v21, %v4931_v7  ;;  %v1422_v25 = vmul.f32 %v4989_v22, %v4931_v7  ;;  %v2078_v12 = vsub.f32 %v1431_v38, %v4991_v19  ;;  %v2084_v32 = vsub.f32 %v1430_v44, %v4996_v41 }
 0x26f   :  { %v4958_v59 = vand.u32 4294901760, %v1421_v51  ;;  %v4960_v55 = vand.u32 4294901760, %v1420_v43  ;;  %v1588_v61 = vand.u32 4294901760, %v1587_v20  ;;  %v1594_v56 = vand.u32 4294901760, %v1593_v4 }
 0x270   :  { %v4999_v27 = vand.u32 4294901760, %v1423_v47  ;;  %v5001_v48 = vand.u32 4294901760, %v1422_v25  ;;  %v2079_v30 = vand.u32 4294901760, %v2078_v12  ;;  %v2085_v26 = vand.u32 4294901760, %v2084_v32 }
 0x271   :  { %1511 = vmatprep.subr.mxu0 %v4958_v59  ;;  %v1589_v31 = vsub.f32 %v1587_v20, %v1588_v61  ;;  %v1599_v1 = vsub.f32 %v1421_v51, %v4958_v59  ;;  %v1595_v15 = vsub.f32 %v1593_v4, %v1594_v56  ;;  %v1605_v2 = vsub.f32 %v1420_v43, %v4960_v55 }
 0x272   :  { %1513 = vmatpush1.msra.mxu0 %v4960_v55  ;;  %v2090_v50 = vsub.f32 %v1423_v47, %v4999_v27  ;;  %v2096_v14 = vsub.f32 %v1422_v25, %v5001_v48  ;;  %v2080_v23 = vsub.f32 %v2078_v12, %v2079_v30  ;;  %v5025_v43 = vsel %vm5336_vm9, 1.0, %v5318_v42 }
 0x273   :  { %1552 = vmatmul.mubr.f32.vlgmr.msra.gmra.mxu0 %v4962_v46  ;;  %1680 = vmatprep.subr.mxu0 %v1587_v20  ;;  %v1590_v54 = vand.u32 4294901760, %v1589_v31  ;;  %v1596_v45 = vand.u32 4294901760, %v1595_v15  ;;  %v1600_v49 = vand.u32 4294901760, %v1599_v1  ;;  %v1606_v58 = vand.u32 4294901760, %v1605_v2 }
 0x274   :  { %1683 = vmatpush1.msra.mxu0 %v1593_v4  ;;  %1722 = vmatprep.mubr.f32.mxu0 %v5318_v42  ;;  %v2091_v8 = vand.u32 4294901760, %v2090_v50  ;;  %v2097_v51 = vand.u32 4294901760, %v2096_v14  ;;  %v2086_v20 = vsub.f32 %v2084_v32, %v2085_v26  ;;  %v1433_v4 = vmul.f32 %v5025_v43, %v4908_v6 }
 0x275   :  { %1591 = vmatprep.subr.mxu1 %v1590_v54  ;;  %1686 = vmatprep.subr.mxu0 %v1599_v1  ;;  %v1601_v10 = vsub.f32 %v1599_v1, %v1600_v49  ;;  %v1607_v52 = vsub.f32 %v1605_v2, %v1606_v58  ;;  %v1424_v63 = vmul.f32 %v4854_v9, %v4931_v7  ;;  %v5049_v1 = vand.u32 4294901760, %v1432_v18 }
 0x276   :  { %1597 = vmatpush1.msra.mxu1 %v1596_v45  ;;  %1689 = vmatpush1.msra.mxu0 %v1605_v2  ;;  %v5044_v38 = vand.u32 4294901760, %v1433_v4 }
 0x277   :  { %1725 = vmatmul.mubr.f32.vlgmr.msra.gmra.mxu0 %v4906_v34  ;;  %1840 = vmatprep.subr.mxu0 %v1588_v61  ;;  %v1602_v57 = vand.u32 4294901760, %v1601_v10  ;;  %v1608_v16 = vand.u32 4294901760, %v1607_v52  ;;  %v2081_v61 = vand.u32 4294901760, %v2080_v23  ;;  %v5054_v2 = vand.u32 4294901760, %v1424_v63 }
 0x278   :  { %1844 = vmatpush1.msra.mxu0 %v1594_v56  ;;  %1885 = vmatprep.mubr.f32.mxu0 %v5318_v42  ;;  %v2098_v56 = vsub.f32 %v2096_v14, %v2097_v51  ;;  %v2569_v9 = vsub.f32 %v1433_v4, %v5044_v38  ;;  %v2575_v44 = vsub.f32 %v1432_v18, %v5049_v1 }
 0x279   :  { %1603 = vmatprep.subr.mxu1 %v1602_v57  ;;  %1848 = vmatprep.subr.mxu0 %v1600_v49  ;;  %v2587_v45 = vsub.f32 %v1424_v63, %v5054_v2  ;;  %v1435_v57 = vmul.f32 %v4875_v5, %v4908_v6 }
 0x27a   :  { %1609 = vmatpush1.msra.mxu1 %v1608_v16  ;;  %1852 = vmatpush1.msra.mxu0 %v1606_v58  ;;  %v2099_v31 = vand.u32 4294901760, %v2098_v56  ;;  %v2570_v49 = vand.u32 4294901760, %v2569_v9  ;;  %v2576_v58 = vand.u32 4294901760, %v2575_v44 }
 0x27b   :  { %1644 = vmatmul.mubr.f32.vlgmr.msra.gmra.mxu1 %v4903_v24  ;;  %1760 = vmatprep.subr.mxu1 %v4927_v13  ;;  %v2588_v52 = vand.u32 4294901760, %v2587_v45 }
 0x27c   :  { %1887 = vmatmul.mubr.f32.vlgmr.msra.gmra.mxu0 %v4903_v24  ;;  %1998 = vmatprep.subr.mxu0 %v4991_v19  ;;  %v2571_v10 = vsub.f32 %v2569_v9, %v2570_v49  ;;  %v2577_v25 = vsub.f32 %v2575_v44, %v2576_v58 }
 0x27d   :  { %1762 = vmatpush1.msra.mxu1 %v4929_v60  ;;  %2000 = vmatpush1.msra.mxu0 %v4996_v41 }
 0x27e   :  { %1764 = vmatprep.subr.mxu1 %v4958_v59  ;;  %2002 = vmatprep.subr.mxu0 %v4999_v27  ;;  %v2578_v5 = vand.u32 4294901760, %v2577_v25 }
 0x27f   :  { %1766 = vmatpush1.msra.mxu1 %v4960_v55  ;;  %1799 = vmatprep.mubr.f32.mxu1 %v5318_v42 }
 0x280   :  { %2004 = vmatpush1.msra.mxu0 %v5001_v48  ;;  %2037 = vmatprep.mubr.f32.mxu0 %v5318_v42 }
 0x281   :  { %1803 = vmatmul.mubr.f32.vlgmr.msra.gmra.mxu1 %v4921_v39  ;;  %1922 = vmatprep.subr.mxu1 %v4927_v13  ;;  %v2092_v13 = vsub.f32 %v2090_v50, %v2091_v8 }
 0x282   :  { %2043 = vmatmul.mubr.f32.vlgmr.msra.gmra.mxu0 %v4962_v46  ;;  %2171 = vmatprep.subr.mxu0 %v2078_v12  ;;  %v2589_v12 = vsub.f32 %v2587_v45, %v2588_v52 }
 0x283   :  { %1924 = vmatpush1.msra.mxu1 %v4929_v60  ;;  %2174 = vmatpush1.msra.mxu0 %v2084_v32  ;;  %v5038_v60 = vsel %vm5337_vm3, 1.0, %v5318_v42  ;;  %v2093_v53 = vand.u32 4294901760, %v2092_v13  ;;  %v1434_v32 = vmul.f32 %v4891_v29, %v4908_v6 }
 0x284   :  { %1926 = vmatprep.subr.mxu1 %v4958_v59  ;;  %2177 = vmatprep.subr.mxu0 %v2090_v50  ;;  %v1425_v59 = vmul.f32 %v5038_v60, %v4931_v7  ;;  %v2590_v29 = vand.u32 4294901760, %v2589_v12 }
 0x285   :  { %1928 = vmatpush1.msra.mxu1 %v4960_v55  ;;  %1961 = vmatprep.mubr.f32.mxu1 %v5318_v42  ;;  %v2087_v55 = vand.u32 4294901760, %v2086_v20  ;;  %v5093_v6 = vand.u32 4294901760, %v1434_v32 }
 0x286   :  { %2180 = vmatpush1.msra.mxu0 %v2096_v14  ;;  %2213 = vmatprep.mubr.f32.mxu0 %v5318_v42  ;;  %v5051_v15 = vand.u32 4294901760, %v1425_v59 }
 0x287   :  { %1963 = vmatmul.mubr.f32.vlgmr.msra.gmra.mxu1 %v4903_v24  ;;  %2082 = vmatprep.subr.mxu1 %v2081_v61 }
 0x288   :  { %2216 = vmatmul.mubr.f32.vlgmr.msra.gmra.mxu0 %v4906_v34  ;;  %2331 = vmatprep.subr.mxu0 %v2079_v30  ;;  %v2581_v54 = vsub.f32 %v1425_v59, %v5051_v15 }
 0x289   :  { %2088 = vmatpush1.msra.mxu1 %v2087_v55  ;;  %2335 = vmatpush1.msra.mxu0 %v2085_v26 }
 0x28a   :  { %2094 = vmatprep.subr.mxu1 %v2093_v53  ;;  %2339 = vmatprep.subr.mxu0 %v2091_v8  ;;  %v2582_v47 = vand.u32 4294901760, %v2581_v54 }
 0x28b   :  { %2100 = vmatpush1.msra.mxu1 %v2099_v31  ;;  %2133 = vmatprep.mubr.f32.mxu1 %v5318_v42 }
 0x28c   :  { %2343 = vmatpush1.msra.mxu0 %v2097_v51  ;;  %2376 = vmatprep.mubr.f32.mxu0 %v5318_v42  ;;  %v2583_v16 = vsub.f32 %v2581_v54, %v2582_v47 }
 0x28d   :  { %2135 = vmatmul.mubr.f32.vlgmr.msra.gmra.mxu1 %v4903_v24  ;;  %2251 = vmatprep.subr.mxu1 %v4991_v19 }
 0x28e   :  { %2378 = vmatmul.mubr.f32.vlgmr.msra.gmra.mxu0 %v4903_v24  ;;  %2489 = vmatprep.subr.mxu0 %v5044_v38  ;;  %v2584_v50 = vand.u32 4294901760, %v2583_v16 }
 0x28f   :  { %2253 = vmatpush1.msra.mxu1 %v4996_v41  ;;  %2491 = vmatpush1.msra.mxu0 %v5049_v1 }
 0x290   :  { %2255 = vmatprep.subr.mxu1 %v4999_v27  ;;  %2493 = vmatprep.subr.mxu0 %v5051_v15 }
 0x291   :  { %2257 = vmatpush1.msra.mxu1 %v5001_v48  ;;  %2290 = vmatprep.mubr.f32.mxu1 %v5318_v42 }
 0x292   :  { %2495 = vmatpush1.msra.mxu0 %v5054_v2  ;;  %2528 = vmatprep.mubr.f32.mxu0 %v5318_v42 }
 0x293   :  { %2294 = vmatmul.mubr.f32.vlgmr.msra.gmra.mxu1 %v4921_v39  ;;  %2413 = vmatprep.subr.mxu1 %v4991_v19  ;;  %v2572_v19 = vand.u32 4294901760, %v2571_v10 }
 0x294   :  { %2534 = vmatmul.mubr.f32.vlgmr.msra.gmra.mxu0 %v4962_v46  ;;  %2662 = vmatprep.subr.mxu0 %v2569_v9  ;;  %v1328_v9 = vadd.f32 %v4969_v35, %v4989_v22 }
 0x295   :  { %2415 = vmatpush1.msra.mxu1 %v4996_v41  ;;  %2665 = vmatpush1.msra.mxu0 %v2575_v44  ;;  %v1427_v41 = vmul.f32 %v4880_v3, %v4931_v7 }
 0x296   :  { %2417 = vmatprep.subr.mxu1 %v4999_v27  ;;  %2668 = vmatprep.subr.mxu0 %v2581_v54  ;;  %v5088_v27 = vand.u32 4294901760, %v1435_v57 }
 0x297   :  { %2419 = vmatpush1.msra.mxu1 %v5001_v48  ;;  %2452 = vmatprep.mubr.f32.mxu1 %v5318_v42  ;;  %v1426_v48 = vmul.f32 %v4896_v11, %v4931_v7  ;;  %v5095_v3 = vand.u32 4294901760, %v1427_v41  ;;  %v3066_v7 = vsub.f32 %v1434_v32, %v5093_v6 }
 0x298   :  { %2671 = vmatpush1.msra.mxu0 %v2587_v45  ;;  %2704 = vmatprep.mubr.f32.mxu0 %v5318_v42  ;;  %v3060_v11 = vsub.f32 %v1435_v57, %v5088_v27 }
 0x299   :  { %2454 = vmatmul.mubr.f32.vlgmr.msra.gmra.mxu1 %v4903_v24  ;;  %2573 = vmatprep.subr.mxu1 %v2572_v19  ;;  %v5098_v14 = vand.u32 4294901760, %v1426_v48  ;;  %v3072_v30 = vsub.f32 %v1427_v41, %v5095_v3  ;;  %v3067_v23 = vand.u32 4294901760, %v3066_v7  ;;  %v1349_v41 = vadd.f32 %v5025_v43, %v5038_v60 }
 0x29a   :  { %2707 = vmatmul.mubr.f32.vlgmr.msra.gmra.mxu0 %v4906_v34  ;;  %2822 = vmatprep.subr.mxu0 %v2570_v49  ;;  %v3061_v8 = vand.u32 4294901760, %v3060_v11 }
 0x29b   :  { %2579 = vmatpush1.msra.mxu1 %v2578_v5  ;;  %2826 = vmatpush1.msra.mxu0 %v2576_v58  ;;  %v3078_v26 = vsub.f32 %v1426_v48, %v5098_v14  ;;  %v3073_v51 = vand.u32 4294901760, %v3072_v30  ;;  %v3068_v13 = vsub.f32 %v3066_v7, %v3067_v23 }
 0x29c   :  { %2585 = vmatprep.subr.mxu1 %v2584_v50  ;;  %2830 = vmatprep.subr.mxu0 %v2582_v47  ;;  %v3062_v20 = vsub.f32 %v3060_v11, %v3061_v8 }
 0x29d   :  { %2591 = vmatpush1.msra.mxu1 %v2590_v29  ;;  %2624 = vmatprep.mubr.f32.mxu1 %v5318_v42  ;;  %v3079_v4 = vand.u32 4294901760, %v3078_v26  ;;  %v3074_v61 = vsub.f32 %v3072_v30, %v3073_v51 }
 0x29e   :  { %2834 = vmatpush1.msra.mxu0 %v2588_v52  ;;  %2867 = vmatprep.mubr.f32.mxu0 %v5318_v42  ;;  %v3063_v56 = vand.u32 4294901760, %v3062_v20 }
 0x29f   :  { %2626 = vmatmul.mubr.f32.vlgmr.msra.gmra.mxu1 %v4903_v24  ;;  %2742 = vmatprep.subr.mxu1 %v5044_v38  ;;  %v3080_v18 = vsub.f32 %v3078_v26, %v3079_v4  ;;  %v3075_v59 = vand.u32 4294901760, %v3074_v61 }
 0x2a0   :  { %2869 = vmatmul.mubr.f32.vlgmr.msra.gmra.mxu0 %v4903_v24  ;;  %2980 = vmatprep.subr.mxu0 %v5088_v27 }
 0x2a1   :  { %2744 = vmatpush1.msra.mxu1 %v5049_v1  ;;  %2982 = vmatpush1.msra.mxu0 %v5093_v6  ;;  %v3081_v55 = vand.u32 4294901760, %v3080_v18 }
 0x2a2   :  { %2746 = vmatprep.subr.mxu1 %v5051_v15  ;;  %2984 = vmatprep.subr.mxu0 %v5095_v3 }
 0x2a3   :  { %2748 = vmatpush1.msra.mxu1 %v5054_v2  ;;  %2781 = vmatprep.mubr.f32.mxu1 %v5318_v42 }
 0x2a4   :  { %2986 = vmatpush1.msra.mxu0 %v5098_v14  ;;  %3019 = vmatprep.mubr.f32.mxu0 %v5318_v42 }
 0x2a5   :  { %2785 = vmatmul.mubr.f32.vlgmr.msra.gmra.mxu1 %v4921_v39  ;;  %2904 = vmatprep.subr.mxu1 %v5044_v38  ;;  %v1321_v38 = vadd.f32 %v4913_v0, %v4936_v36 }
 0x2a6   :  { %3025 = vmatmul.mubr.f32.vlgmr.msra.gmra.mxu0 %v4962_v46  ;;  %3153 = vmatprep.subr.mxu0 %v3060_v11  ;;  %v3069_v46 = vand.u32 4294901760, %v3068_v13 }
 0x2a7   :  { %2906 = vmatpush1.msra.mxu1 %v5049_v1  ;;  %3156 = vmatpush1.msra.mxu0 %v3066_v7  ;;  %v1350_v7 = vrot.slane %v1349_v41, 4 }
 0x2a8   :  { %2908 = vmatprep.subr.mxu1 %v5051_v15  ;;  %3159 = vmatprep.subr.mxu0 %v3072_v30 }
 0x2a9   :  { %2910 = vmatpush1.msra.mxu1 %v5054_v2  ;;  %2943 = vmatprep.mubr.f32.mxu1 %v5318_v42  ;;  %v1351_v60 = vadd.f32 %v1350_v7, %v1349_v41 }
 0x2aa   :  { %3162 = vmatpush1.msra.mxu0 %v3078_v26  ;;  %3195 = vmatprep.mubr.f32.mxu0 %v5318_v42  ;;  %v1343_v26 = vrot.slane %v4862_v40, 4 }
 0x2ab   :  { %2945 = vmatmul.mubr.f32.vlgmr.msra.gmra.mxu1 %v4903_v24  ;;  %3064 = vmatprep.subr.mxu1 %v3063_v56 }
 0x2ac   :  { %3198 = vmatmul.mubr.f32.vlgmr.msra.gmra.mxu0 %v4906_v34  ;;  %3313 = vmatprep.subr.mxu0 %v3061_v8  ;;  %v1314_v34 = vadd.f32 %v4918_v28, %v4941_v17  ;;  %v1329_v28 = vrot.slane %v1328_v9, 4  ;;  %v1344_v56 = vadd.f32 %v1343_v26, %v4862_v40 }
 0x2ad   :  { %3070 = vmatpush1.msra.mxu1 %v3069_v46  ;;  %3317 = vmatpush1.msra.mxu0 %v3067_v23 }
 0x2ae   :  { %3076 = vmatprep.subr.mxu1 %v3075_v59  ;;  %3321 = vmatprep.subr.mxu0 %v3073_v51  ;;  %v1315_v63 = vrot.slane %v1314_v34, 4  ;;  %v1330_v49 = vadd.f32 %v1329_v28, %v1328_v9 }
 0x2af   :  { %3082 = vmatpush1.msra.mxu1 %v3081_v55  ;;  %3115 = vmatprep.mubr.f32.mxu1 %v5318_v42 }
 0x2b0   :  { %3325 = vmatpush1.msra.mxu0 %v3079_v4  ;;  %3358 = vmatprep.mubr.f32.mxu0 %v5318_v42  ;;  %v1316_v53 = vadd.f32 %v1315_v63, %v1314_v34  ;;  %v1331_v57 = vrot.slane %v1330_v49, 2 }
 0x2b1   :  { %3117 = vmatmul.mubr.f32.vlgmr.msra.gmra.mxu1 %v4903_v24  ;;  %3233 = vmatprep.subr.mxu1 %v5088_v27 }
 0x2b2   :  { %3360 = vmatmul.mubr.f32.vlgmr.msra.gmra.mxu0 %v4903_v24  ;;  %3235 = vmatpush1.msra.mxu1 %v5093_v6  ;;  %v1317_v1 = vrot.slane %v1316_v53, 2  ;;  %v1332_v22 = vadd.f32 %v1331_v57, %v1330_v49  ;;  %v1364_v49 = vrot.slane %v4884_v62, 4 }
 0x2b3   :  { %3237 = vmatprep.subr.mxu1 %v5095_v3  ;;  %3272 = vmatprep.mubr.f32.mxu1 %v5318_v42 }
 0x2b4   :  { %3239 = vmatpush1.msra.mxu1 %v5098_v14  ;;  %v1318_v2 = vadd.f32 %v1317_v1, %v1316_v53  ;;  %v1333_v29 = vrot.slane %v1332_v22, 1  ;;  %v1352_v53 = vrot.slane %v1351_v60, 2 }
 0x2b5   :  { %3276 = vmatmul.mubr.f32.vlgmr.msra.gmra.mxu1 %v4921_v39  ;;  %3395 = vmatprep.subr.mxu1 %v5088_v27  ;;  %v1322_v39 = vrot.slane %v1321_v38, 4 }
 0x2b6   :  { %3397 = vmatpush1.msra.mxu1 %v5093_v6  ;;  %3434 = vmatprep.mubr.f32.mxu1 %v5318_v42  ;;  %v1319_v44 = vrot.slane %v1318_v2, 1  ;;  %v5154_v20 = vadd.f32 %v1333_v29, %v1332_v22 }
 0x2b7   :  { %3399 = vmatprep.subr.mxu1 %v5095_v3  ;;  %v1323_v31 = vadd.f32 %v1322_v39, %v1321_v38 }
 0x2b8   :  { %3401 = vmatpush1.msra.mxu1 %v5098_v14  ;;  %v1320_v45 = vadd.f32 %v1319_v44, %v1318_v2  ;;  %v1380_v55 = vmax.f32 %v5154_v20, 1.0  ;;  %vm1372_vm0 = vcmp.gt.f32.partialorder %v5154_v20, 1.0 }
 0x2b9   :  { %3436 = vmatmul.mubr.f32.vlgmr.msra.gmra.mxu1 %v4903_v24  ;;  %v1324_v15 = vrot.slane %v1323_v31, 2  ;;  %v1335_v24 = vadd.f32 %v4956_v33, %v4980_v21 }
 0x2ba   :  { %v1378_v10 = vmax.f32 %v1320_v45, 1.0  ;;  %vm1370_vm6 = vcmp.gt.f32.partialorder %v1320_v45, 1.0 }
 0x2bb   :  { %v1325_v42 = vadd.f32 %v1324_v15, %v1323_v31  ;;  %v1336_v17 = vrot.slane %v1335_v24, 4  ;;  %v1345_v15 = vrot.slane %v1344_v56, 2 }
 0x2bc   :  { %3563 = vrcp.f32 %v1378_v10 }
 0x2bd   :  { %v1326_v54 = vrot.slane %v1325_v42, 1  ;;  %v1337_v47 = vadd.f32 %v1336_v17, %v1335_v24  ;;  %v1346_v17 = vadd.f32 %v1345_v15, %v1344_v56 }
 0x2bf   :  { %v1327_v36 = vadd.f32 %v1326_v54, %v1325_v42  ;;  %v1338_v19 = vrot.slane %v1337_v47, 2  ;;  %v1353_v54 = vadd.f32 %v1352_v53, %v1351_v60 }
 0x2c1   :  { %v1379_v25 = vmax.f32 %v1327_v36, 1.0  ;;  %v1339_v32 = vadd.f32 %v1338_v19, %v1337_v47  ;;  %vm1371_vm12 = vcmp.gt.f32.partialorder %v1327_v36, 1.0  ;;  %v1354_v10 = vrot.slane %v1353_v54, 1 }
 0x2c2   :  { %v1365_v19 = vadd.f32 %v1364_v49, %v4884_v62 }
 0x2c3   :  { %3565 = vrcp.f32 %v1379_v25  ;;  %v1340_v3 = vrot.slane %v1339_v32, 1  ;;  %v1347_v25 = vrot.slane %v1346_v17, 1 }
 0x2c4   :  { %3567 = vrcp.f32 %v1380_v55 }
 0x2c5   :  { %v5156_v4 = vadd.f32 %v1340_v3, %v1339_v32  ;;  %v1355_v32 = vadd.f32 %v1354_v10, %v1353_v54  ;;  %v1348_v41 = vadd.f32 %v1347_v25, %v1346_v17 }
 0x2c7   :  { %v1381_v38 = vmax.f32 %v5156_v4, 1.0  ;;  %vm1373_vm11 = vcmp.gt.f32.partialorder %v5156_v4, 1.0  ;;  %vm1374_vm7 = vcmp.gt.f32.partialorder %v1348_v41, 1.0  ;;  %vm1375_vm10 = vcmp.gt.f32.partialorder %v1355_v32, 1.0 }
 0x2c9   :  { %v3564_v13 = vpop.eup %3563  ;;  %3569 = vrcp.f32 %v1381_v38 }
 0x2ca   :  { %v1402_v31 = vsel %vm1370_vm6, %v3564_v13, 1.0 }
 0x2d0   :  { %v3566_v18 = vpop.eup %3565 }
 0x2d1   :  { %v1403_v1 = vsel %vm1371_vm12, %v3566_v18, 1.0 }
 0x333   :  { %v1553_v0 = vpop.f32.mrf.mxu0 }
 0x335   :  { %v1555_v58 = vpop.f32.mrf.mxu0 }
 0x337   :  { %v1726_v52 = vpop.f32.mrf.mxu0 }
 0x339   :  { %v1728_v16 = vpop.f32.mrf.mxu0 }
 0x33b   :  { %v1645_v35 = vpop.f32.mrf.mxu1 }
 0x33c   :  { %v1646_v33 = vadd.f32 %v1645_v35, %v1553_v0  ;;  %v1888_v21 = vpop.f32.mrf.mxu0 }
 0x33d   :  { %v1647_v12 = vpop.f32.mrf.mxu1 }
 0x33e   :  { %v1648_v5 = vadd.f32 %v1647_v12, %v1555_v58  ;;  %v1890_v27 = vpop.f32.mrf.mxu0  ;;  %v1727_v48 = vadd.f32 %v1726_v52, %v1646_v33  ;;  %v1357_v58 = vrot.slane %v4900_v37, 4 }
 0x340   :  { %v1729_v50 = vadd.f32 %v1728_v16, %v1648_v5  ;;  %v1358_v33 = vadd.f32 %v1357_v58, %v4900_v37 }
 0x341   :  { %v1804_v6 = vpop.f32.mrf.mxu1 }
 0x342   :  { %v1805_v14 = vadd.f32 %v1804_v6, %v1727_v48  ;;  %v2044_v11 = vpop.f32.mrf.mxu0  ;;  %v3568_v48 = vpop.eup %3567  ;;  %v1359_v29 = vrot.slane %v1358_v33, 2 }
 0x343   :  { %v1806_v30 = vpop.f32.mrf.mxu1  ;;  %v3570_v6 = vpop.eup %3569 }
 0x344   :  { %v1807_v8 = vadd.f32 %v1806_v30, %v1729_v50  ;;  %v2046_v23 = vpop.f32.mrf.mxu0  ;;  %v1889_v51 = vadd.f32 %v1888_v21, %v1805_v14  ;;  %v1382_v30 = vmax.f32 %v1348_v41, 1.0 }
 0x346   :  { %v1891_v43 = vadd.f32 %v1890_v27, %v1807_v8  ;;  %v1366_v27 = vrot.slane %v1365_v19, 2  ;;  %v1404_v8 = vsel %vm1372_vm0, %v3568_v48, 1.0 }
 0x347   :  { %v1964_v61 = vpop.f32.mrf.mxu1 }
 0x348   :  { %v1965_v46 = vadd.f32 %v1964_v61, %v1889_v51  ;;  %v2217_v59 = vpop.f32.mrf.mxu0  ;;  %v1367_v26 = vadd.f32 %v1366_v27, %v1365_v19  ;;  %v1360_v51 = vadd.f32 %v1359_v29, %v1358_v33 }
 0x349   :  { %v1966_v34 = vpop.f32.mrf.mxu1 }
 0x34a   :  { %v1967_v63 = vadd.f32 %v1966_v34, %v1891_v43  ;;  %v2219_v39 = vpop.f32.mrf.mxu0  ;;  %v3442_v2 = vmul.f32 %v1965_v46, %v1402_v31  ;;  %v1368_v46 = vrot.slane %v1367_v26, 1  ;;  %v1361_v55 = vrot.slane %v1360_v51, 1 }
 0x34c   :  { %v3443_v42 = vmul.f32 %v1967_v63, %v1403_v1  ;;  %v1369_v63 = vadd.f32 %v1368_v46, %v1367_v26  ;;  %v1362_v53 = vadd.f32 %v1361_v55, %v1360_v51 }
 0x34d   :  { %v2136_v40 = vpop.f32.mrf.mxu1 }
 0x34e   :  { %v3458_v9 = vcombine.low %v3442_v2, %v3443_v42  ;;  %v2137_v24 = vadd.f32 %v2136_v40, %v2044_v11  ;;  %v2379_v44 = vpop.f32.mrf.mxu0  ;;  %v1383_v11 = vmax.f32 %v1355_v32, 1.0  ;;  %v1385_v40 = vmax.f32 %v1369_v63, 1.0 }
 0x34f   :  { %v2138_v28 = vpop.f32.mrf.mxu1  ;;  %vm1376_vm13 = vcmp.gt.f32.partialorder %v1362_v53, 1.0  ;;  %vm1377_vm14 = vcmp.gt.f32.partialorder %v1369_v63, 1.0 }
 0x350   :  { %3466 = vst [vmem:[%s5185_s6] sm:$0x77] %v3458_v9  ;;  %v2139_v45 = vadd.f32 %v2138_v28, %v2046_v23  ;;  %v2381_v0 = vpop.f32.mrf.mxu0  ;;  %v2218_v36 = vadd.f32 %v2217_v59, %v2137_v24  ;;  %v1405_v23 = vsel %vm1373_vm11, %v3570_v6, 1.0  ;;  %3571 = vrcp.f32 %v1383_v11 }
 0x351   :  { %3573 = vrcp.f32 %v1382_v30  ;;  %v1384_v24 = vmax.f32 %v1362_v53, 1.0 }
 0x352   :  { %v2220_v47 = vadd.f32 %v2219_v39, %v2139_v45  ;;  %3575 = vrcp.f32 %v1385_v40 }
 0x353   :  { %v2295_v52 = vpop.f32.mrf.mxu1  ;;  %3577 = vrcp.f32 %v1384_v24 }
 0x354   :  { %v2296_v57 = vadd.f32 %v2295_v52, %v2218_v36  ;;  %v2535_v16 = vpop.f32.mrf.mxu0 }
 0x355   :  { %v2297_v35 = vpop.f32.mrf.mxu1 }
 0x356   :  { %v2298_v21 = vadd.f32 %v2297_v35, %v2220_v47  ;;  %v2537_v22 = vpop.f32.mrf.mxu0  ;;  %v2380_v12 = vadd.f32 %v2379_v44, %v2296_v57 }
 0x358   :  { %v2382_v5 = vadd.f32 %v2381_v0, %v2298_v21 }
 0x359   :  { %v2455_v50 = vpop.f32.mrf.mxu1 }
 0x35a   :  { %v2456_v3 = vadd.f32 %v2455_v50, %v2380_v12  ;;  %v2708_v14 = vpop.f32.mrf.mxu0 }
 0x35b   :  { %v2457_v7 = vpop.f32.mrf.mxu1 }
 0x35c   :  { %v2458_v62 = vadd.f32 %v2457_v7, %v2382_v5  ;;  %v2710_v37 = vpop.f32.mrf.mxu0  ;;  %v3444_v43 = vmul.f32 %v2456_v3, %v1404_v8 }
 0x35d   :  { %v3572_v54 = vpop.eup %3571 }
 0x35e   :  { %v3445_v60 = vmul.f32 %v2458_v62, %v1405_v23  ;;  %v3574_v17 = vpop.eup %3573  ;;  %v1407_v47 = vsel %vm1375_vm10, %v3572_v54, 1.0 }
 0x35f   :  { %v2627_v13 = vpop.f32.mrf.mxu1  ;;  %v1406_v58 = vsel %vm1374_vm7, %v3574_v17, 1.0  ;;  %v3576_v50 = vpop.eup %3575 }
 0x360   :  { %v3459_v61 = vcombine.low %v3444_v43, %v3445_v60  ;;  %v2628_v56 = vadd.f32 %v2627_v13, %v2535_v16  ;;  %v2870_v18 = vpop.f32.mrf.mxu0  ;;  %v3578_v3 = vpop.eup %3577 }
 0x361   :  { %v2629_v59 = vpop.f32.mrf.mxu1  ;;  %v1408_v62 = vsel %vm1376_vm13, %v3578_v3, 1.0 }
 0x362   :  { %3467 = vst [vmem:[%s5185_s6 + $0x8] sm:$0x77] %v3459_v61  ;;  %v2630_v20 = vadd.f32 %v2629_v59, %v2537_v22  ;;  %v2872_v4 = vpop.f32.mrf.mxu0  ;;  %v2709_v34 = vadd.f32 %v2708_v14, %v2628_v56 }
 0x364   :  { %v2711_v38 = vadd.f32 %v2710_v37, %v2630_v20  ;;  %v1409_v37 = vsel %vm1377_vm14, %v3576_v50, 1.0 }
 0x365   :  { %v2786_v39 = vpop.f32.mrf.mxu1 }
 0x366   :  { %v2787_v31 = vadd.f32 %v2786_v39, %v2709_v34  ;;  %v3026_v1 = vpop.f32.mrf.mxu0 }
 0x367   :  { %v2788_v15 = vpop.f32.mrf.mxu1 }
 0x368   :  { %v2789_v2 = vadd.f32 %v2788_v15, %v2711_v38  ;;  %v2871_v42 = vadd.f32 %v2870_v18, %v2787_v31  ;;  %v3028_v9 = vpop.f32.mrf.mxu0 }
 0x36a   :  { %v2873_v44 = vadd.f32 %v2872_v4, %v2789_v2 }
 0x36b   :  { %v2946_v28 = vpop.f32.mrf.mxu1 }
 0x36c   :  { %v2947_v45 = vadd.f32 %v2946_v28, %v2871_v42  ;;  %v3199_v0 = vpop.f32.mrf.mxu0 }
 0x36d   :  { %v2948_v36 = vpop.f32.mrf.mxu1 }
 0x36e   :  { %v2949_v49 = vadd.f32 %v2948_v36, %v2873_v44  ;;  %v3446_v10 = vmul.f32 %v2947_v45, %v1406_v58  ;;  %v3201_v25 = vpop.f32.mrf.mxu0 }
 0x370   :  { %v3447_v52 = vmul.f32 %v2949_v49, %v1407_v47 }
 0x371   :  { %v3118_v57 = vpop.f32.mrf.mxu1 }
 0x372   :  { %v3460_v16 = vcombine.low %v3446_v10, %v3447_v52  ;;  %v3119_v19 = vadd.f32 %v3118_v57, %v3026_v1  ;;  %v3361_v22 = vpop.f32.mrf.mxu0 }
 0x373   :  { %v3120_v35 = vpop.f32.mrf.mxu1 }
 0x374   :  { %3468 = vst [vmem:[%s5185_s6 + $0x10] sm:$0x77] %v3460_v16  ;;  %v3121_v33 = vadd.f32 %v3120_v35, %v3028_v9  ;;  %v3200_v21 = vadd.f32 %v3199_v0, %v3119_v19  ;;  %v3363_v29 = vpop.f32.mrf.mxu0 }
 0x375   :  { %v3277_v12 = vpop.f32.mrf.mxu1 }
 0x376   :  { %v3278_v41 = vadd.f32 %v3277_v12, %v3200_v21  ;;  %v3202_v32 = vadd.f32 %v3201_v25, %v3121_v33 }
 0x377   :  { %v3279_v5 = vpop.f32.mrf.mxu1 }
 0x378   :  { %v3280_v27 = vadd.f32 %v3279_v5, %v3202_v32  ;;  %v3362_v48 = vadd.f32 %v3361_v22, %v3278_v41 }
 0x379   :  { %v3437_v6 = vpop.f32.mrf.mxu1 }
 0x37a   :  { %v3438_v14 = vadd.f32 %v3437_v6, %v3362_v48  ;;  %v3364_v11 = vadd.f32 %v3363_v29, %v3280_v27 }
 0x37b   :  { %v3439_v7 = vpop.f32.mrf.mxu1 }
 0x37c   :  { %v3440_v30 = vadd.f32 %v3439_v7, %v3364_v11  ;;  %v3448_v26 = vmul.f32 %v3438_v14, %v1408_v62 }
 0x37e   :  { %v3449_v8 = vmul.f32 %v3440_v30, %v1409_v37 }
 0x380   :  { %v3461_v23 = vcombine.low %v3448_v26, %v3449_v8 }
 0x382   :  { %3469 = vst [vmem:[%s5185_s6 + $0x18] sm:$0x77] %v3461_v23 }
 0x383   :  { %3474 = vsyncpa [#allocation3], 1 }
 0x384   :  { %3475 = vsyncpa [#allocation5], 1 }

</bundles_post_ra>
